<compile_context>
chip_gen: v7x
topology: tpu7x:2x2x1
jax: 0.10.0
libtpu: 0.0.40
codegen_flags: <defaults>
</compile_context>

<pallas_src>
import jax
import jax.numpy as jnp
from jax import lax
from jax.experimental import pallas as pl
from jax.experimental.pallas import tpu as pltpu


# ------------------------------- Pallas kernel -------------------------------

def _lenet_fused_kernel(
    x_ref,      # (1, 1, 28, 28)  one image
    n1_ref,     # (5, 28, 144)    folded conv1 weights (per height offset di)
    b1e_ref,    # (1, 144)        conv1 bias expanded over width
    c1_ref,     # (2, 144, 72)    pool1 column-phase selectors
    r12_ref,    # (2, 12, 24)     pool1 row-phase selectors
    m2_ref,     # (5, 72, 128)    folded conv2 weights
    b2e_ref,    # (1, 128)        conv2 bias expanded over width
    c2_ref,     # (2, 128, 64)    pool2 column-phase selectors
    r4_ref,     # (2, 4, 8)       pool2 row-phase selectors
    wf1_ref,    # (256, 120)      permuted fc1 weight (rows = u*64 + co*4 + v)
    bf1_ref,    # (1, 120)
    wf2_ref,    # (120, 84)
    bf2_ref,    # (1, 84)
    wf3_ref,    # (84, 10)
    bf3_ref,    # (1, 10)
    out_ref,    # (1, 1, 10)
):
    f32 = jnp.float32
    x = x_ref[0, 0]                                           # (28, 28)

    # ---- conv1 + bias + ReLU : (24, 6*24), column index = co*24 + j ----
    acc1 = jnp.dot(x[0:24, :], n1_ref[0], preferred_element_type=f32)
    for di in range(1, 5):
        acc1 = acc1 + jnp.dot(x[di:di + 24, :], n1_ref[di],
                              preferred_element_type=f32)
    h1 = jnp.maximum(acc1 + b1e_ref[...], 0.0)                # (24, 144)

    # ---- 2x2 maxpool : (12, 6*12) ----
    cp = jnp.maximum(jnp.dot(h1, c1_ref[0], preferred_element_type=f32),
                     jnp.dot(h1, c1_ref[1], preferred_element_type=f32))   # (24, 72)
    p1 = jnp.maximum(jnp.dot(r12_ref[0], cp, preferred_element_type=f32),
                     jnp.dot(r12_ref[1], cp, preferred_element_type=f32))  # (12, 72)

    # ---- conv2 + bias + ReLU : (8, 16*8), column index = co*8 + j ----
    acc2 = jnp.dot(p1[0:8, :], m2_ref[0], preferred_element_type=f32)
    for di in range(1, 5):
        acc2 = acc2 + jnp.dot(p1[di:di + 8, :], m2_ref[di],
                              preferred_element_type=f32)
    h2 = jnp.maximum(acc2 + b2e_ref[...], 0.0)                # (8, 128)

    # ---- 2x2 maxpool : (4, 16*4) ----
    cp2 = jnp.maximum(jnp.dot(h2, c2_ref[0], preferred_element_type=f32),
                      jnp.dot(h2, c2_ref[1], preferred_element_type=f32))  # (8, 64)
    p2 = jnp.maximum(jnp.dot(r4_ref[0], cp2, preferred_element_type=f32),
                     jnp.dot(r4_ref[1], cp2, preferred_element_type=f32))  # (4, 64)

    # ---- fc1 + ReLU : contract (4, 64) feature block against permuted W1 ----
    wf1 = wf1_ref[...]
    a1 = bf1_ref[...]                                         # (1, 120)
    for u in range(4):
        a1 = a1 + jnp.dot(p2[u:u + 1, :], wf1[u * 64:(u + 1) * 64, :],
                          preferred_element_type=f32)
    f1 = jnp.maximum(a1, 0.0)                                 # (1, 120)

    # ---- fc2 + ReLU, fc3 + ReLU (final ReLU matches the module) ----
    f2 = jnp.maximum(jnp.dot(f1, wf2_ref[...], preferred_element_type=f32)
                     + bf2_ref[...], 0.0)                     # (1, 84)
    f3 = jnp.maximum(jnp.dot(f2, wf3_ref[...], preferred_element_type=f32)
                     + bf3_ref[...], 0.0)                     # (1, 10)

    out_ref[0] = f3


# ------------------------- one-time parameter prep ---------------------------

def prep_lenet_params(params):
    """Fold conv weights into banded matmul matrices, build one-hot pooling
    selectors and permuted FC weights.  Called once; outputs are kernel-ready
    and stay resident in VMEM across the whole grid."""
    f32 = jnp.float32

    def fold_conv(w, w_in):
        # w: (Cout, Cin, 5, 5) -> (5, Cin*w_in, Cout*w_out)
        # N[di, ci*w_in + c, co*w_out + j] = w[co, ci, di, c - j] if 0<=c-j<5
        cout, cin, kh, kw = w.shape
        w_out = w_in - kw + 1
        c = jnp.arange(w_in)[:, None, None]
        j = jnp.arange(w_out)[None, :, None]
        d = jnp.arange(kw)[None, None, :]
        e = (c == j + d).astype(f32)                          # (w_in, w_out, kw)
        nf = jnp.einsum('oiad,cjd->aicoj', w.astype(f32), e)  # (kh,cin,w_in,cout,w_out)
        return nf.reshape(kh, cin * w_in, cout * w_out)

    def pool_col_sel(n_ch, w_in):
        # (2, n_ch*w_in, n_ch*(w_in//2)); [phase, c*w_in+w, c*(w_in//2)+v] = (w == 2v+phase)
        w_out = w_in // 2
        r = jnp.arange(n_ch * w_in)
        c = jnp.arange(n_ch * w_out)
        rc, rw = r[:, None] // w_in, r[:, None] % w_in
        cc, cv = c[None, :] // w_out, c[None, :] % w_out
        return jnp.stack([((rc == cc) & (rw == 2 * cv + p)).astype(f32)
                          for p in (0, 1)])

    def pool_row_sel(h_out):
        # (2, h_out, 2*h_out); [phase, u, i] = (i == 2u + phase)
        u = jnp.arange(h_out)[:, None]
        i = jnp.arange(2 * h_out)[None, :]
        return jnp.stack([(i == 2 * u + p).astype(f32) for p in (0, 1)])

    # fc1 weight permuted so it consumes the in-kernel (u, co*4+v) feature layout
    wf1 = (params["w_fc1"].astype(f32)
           .reshape(120, 16, 4, 4)        # (n, co, u, v)
           .transpose(2, 1, 3, 0)         # (u, co, v, n)
           .reshape(256, 120))            # row = u*64 + co*4 + v

    return {
        "n1":  fold_conv(params["w_conv1"], 28),                            # (5, 28, 144)
        "b1e": jnp.repeat(params["b_conv1"].astype(f32), 24)[None, :],      # (1, 144)
        "c1":  pool_col_sel(6, 24),                                         # (2, 144, 72)
        "r12": pool_row_sel(12),                                            # (2, 12, 24)
        "m2":  fold_conv(params["w_conv2"], 12),                            # (5, 72, 128)
        "b2e": jnp.repeat(params["b_conv2"].astype(f32), 8)[None, :],       # (1, 128)
        "c2":  pool_col_sel(16, 8),                                         # (2, 128, 64)
        "r4":  pool_row_sel(4),                                             # (2, 4, 8)
        "wf1": wf1,                                                         # (256, 120)
        "bf1": params["b_fc1"].astype(f32)[None, :],                        # (1, 120)
        "wf2": params["w_fc2"].astype(f32).T,                               # (120, 84)
        "bf2": params["b_fc2"].astype(f32)[None, :],                        # (1, 84)
        "wf3": params["w_fc3"].astype(f32).T,                               # (84, 10)
        "bf3": params["b_fc3"].astype(f32)[None, :],                        # (1, 10)
    }


# --------------------------------- forward -----------------------------------

_CONST_ORDER = ("n1", "b1e", "c1", "r12", "m2", "b2e", "c2", "r4",
                "wf1", "bf1", "wf2", "bf2", "wf3", "bf3")


def _resident_spec(arr):
    ndim = arr.ndim
    return pl.BlockSpec(arr.shape, lambda b, _n=ndim: (0,) * _n)


def lenet_forward(prepped, x):
    """x: (B, 1, 28, 28) float32 NCHW -> logits (B, 10). Single pallas_call."""
    assert x.ndim == 4 and x.shape[1:] == (1, 28, 28)
    B = x.shape[0]
    x = x.astype(jnp.float32)
    consts = [prepped[k] for k in _CONST_ORDER]

    in_specs = [pl.BlockSpec((1, 1, 28, 28), lambda b: (b, 0, 0, 0))]
    in_specs += [_resident_spec(a) for a in consts]

    out = pl.pallas_call(
        _lenet_fused_kernel,
        out_shape=jax.ShapeDtypeStruct((B, 1, 10), jnp.float32),
        grid=(B,),
        in_specs=in_specs,
        out_specs=pl.BlockSpec((1, 1, 10), lambda b: (b, 0, 0)),
        compiler_params=pltpu.CompilerParams(
            dimension_semantics=("parallel",)),
    )(x, *consts)
    return out.reshape(B, 10)


# ------------------------- params + pure-JAX reference -----------------------

def _uniform(key, shape, bound):
    return jax.random.uniform(key, shape, jnp.float32, -bound, bound)


def init_lenet_params(key):
    ks = jax.random.split(key, 10)
    p = {}
    p["w_conv1"] = _uniform(ks[0], (6, 1, 5, 5), 1.0 / (25 ** 0.5))
    p["b_conv1"] = _uniform(ks[1], (6,), 1.0 / (25 ** 0.5))
    p["w_conv2"] = _uniform(ks[2], (16, 6, 5, 5), 1.0 / (150 ** 0.5))
    p["b_conv2"] = _uniform(ks[3], (16,), 1.0 / (150 ** 0.5))
    p["w_fc1"] = _uniform(ks[4], (120, 256), 1.0 / (256 ** 0.5))
    p["b_fc1"] = _uniform(ks[5], (120,), 1.0 / (256 ** 0.5))
    p["w_fc2"] = _uniform(ks[6], (84, 120), 1.0 / (120 ** 0.5))
    p["b_fc2"] = _uniform(ks[7], (84,), 1.0 / (120 ** 0.5))
    p["w_fc3"] = _uniform(ks[8], (10, 84), 1.0 / (84 ** 0.5))
    p["b_fc3"] = _uniform(ks[9], (10,), 1.0 / (84 ** 0.5))
    return p


def lenet_reference(params, x):
    """Pure-JAX reference matching the PyTorch module, for a correctness check."""
    def conv(x, w, b):
        y = lax.conv_general_dilated(
            x, w, window_strides=(1, 1), padding='VALID',
            dimension_numbers=('NCHW', 'OIHW', 'NCHW'))
        return y + b[None, :, None, None]

    y = jnp.maximum(conv(x, params["w_conv1"], params["b_conv1"]), 0.0)
    y = lax.reduce_window(y, -jnp.inf, lax.max, (1, 1, 2, 2), (1, 1, 2, 2), 'VALID')
    y = jnp.maximum(conv(y, params["w_conv2"], params["b_conv2"]), 0.0)
    y = lax.reduce_window(y, -jnp.inf, lax.max, (1, 1, 2, 2), (1, 1, 2, 2), 'VALID')
    f = y.reshape(y.shape[0], -1)
    f = jnp.maximum(f @ params["w_fc1"].T + params["b_fc1"], 0.0)
    f = jnp.maximum(f @ params["w_fc2"].T + params["b_fc2"], 0.0)
    f = jnp.maximum(f @ params["w_fc3"].T + params["b_fc3"], 0.0)
    return f


# ----------------------------------- main -------------------------------------

if __name__ == "__main__":
    key = jax.random.PRNGKey(0)
    pkey, xkey = jax.random.split(key)
    params = init_lenet_params(pkey)
    x = jax.random.normal(xkey, (2, 1, 28, 28), jnp.float32)

    prepped = prep_lenet_params(params)          # one-time weight prep (hoisted)
    fwd = jax.jit(lenet_forward)

    y = jax.block_until_ready(fwd(prepped, x))
    assert y.shape == (2, 10) and y.dtype == jnp.float32
    assert bool(jnp.all(y >= 0.0))               # final ReLU, as in the module

    y_ref = jax.block_until_ready(lenet_reference(params, x))
    max_err = float(jnp.max(jnp.abs(y - y_ref)))
    assert bool(jnp.allclose(y, y_ref, rtol=2e-2, atol=2e-2)), f"max abs err {max_err}"

    print("KERNEL_OK")
</pallas_src>

<mosaic_0001>
module attributes {stable_mosaic.version = 11 : i64} {
  func.func @_lenet_fused_kernel(%arg0: i32, %arg1: memref<1x1x28x28xf32, #tpu.memory_space<vmem>>, %arg2: memref<5x28x144xf32, #tpu.memory_space<vmem>>, %arg3: memref<1x144xf32, #tpu.memory_space<vmem>>, %arg4: memref<2x144x72xf32, #tpu.memory_space<vmem>>, %arg5: memref<2x12x24xf32, #tpu.memory_space<vmem>>, %arg6: memref<5x72x128xf32, #tpu.memory_space<vmem>>, %arg7: memref<1x128xf32, #tpu.memory_space<vmem>>, %arg8: memref<2x128x64xf32, #tpu.memory_space<vmem>>, %arg9: memref<2x4x8xf32, #tpu.memory_space<vmem>>, %arg10: memref<256x120xf32, #tpu.memory_space<vmem>>, %arg11: memref<1x120xf32, #tpu.memory_space<vmem>>, %arg12: memref<120x84xf32, #tpu.memory_space<vmem>>, %arg13: memref<1x84xf32, #tpu.memory_space<vmem>>, %arg14: memref<84x10xf32, #tpu.memory_space<vmem>>, %arg15: memref<1x10xf32, #tpu.memory_space<vmem>>, %arg16: memref<1x1x10xf32, #tpu.memory_space<vmem>>) attributes {dimension_semantics = [#tpu.dimension_semantics<parallel>], iteration_bounds = array<i64: 2>, scalar_prefetch = 0 : i64, scratch_operands = 0 : i64, tpu.core_type = #tpu.core_type<tc>, window_params = [{transform_indices = @transform_0, window_bounds = array<i64: 1, 1, 28, 28>}, {pipeline_mode = #tpu.pipeline_mode<synchronous>, transform_indices = @transform_1, window_bounds = array<i64: 5, 28, 144>}, {pipeline_mode = #tpu.pipeline_mode<synchronous>, transform_indices = @transform_2, window_bounds = array<i64: 1, 144>}, {pipeline_mode = #tpu.pipeline_mode<synchronous>, transform_indices = @transform_3, window_bounds = array<i64: 2, 144, 72>}, {pipeline_mode = #tpu.pipeline_mode<synchronous>, transform_indices = @transform_4, window_bounds = array<i64: 2, 12, 24>}, {pipeline_mode = #tpu.pipeline_mode<synchronous>, transform_indices = @transform_5, window_bounds = array<i64: 5, 72, 128>}, {pipeline_mode = #tpu.pipeline_mode<synchronous>, transform_indices = @transform_6, window_bounds = array<i64: 1, 128>}, {pipeline_mode = #tpu.pipeline_mode<synchronous>, transform_indices = @transform_7, window_bounds = array<i64: 2, 128, 64>}, {pipeline_mode = #tpu.pipeline_mode<synchronous>, transform_indices = @transform_8, window_bounds = array<i64: 2, 4, 8>}, {pipeline_mode = #tpu.pipeline_mode<synchronous>, transform_indices = @transform_9, window_bounds = array<i64: 256, 120>}, {pipeline_mode = #tpu.pipeline_mode<synchronous>, transform_indices = @transform_10, window_bounds = array<i64: 1, 120>}, {pipeline_mode = #tpu.pipeline_mode<synchronous>, transform_indices = @transform_11, window_bounds = array<i64: 120, 84>}, {pipeline_mode = #tpu.pipeline_mode<synchronous>, transform_indices = @transform_12, window_bounds = array<i64: 1, 84>}, {pipeline_mode = #tpu.pipeline_mode<synchronous>, transform_indices = @transform_13, window_bounds = array<i64: 84, 10>}, {pipeline_mode = #tpu.pipeline_mode<synchronous>, transform_indices = @transform_14, window_bounds = array<i64: 1, 10>}, {transform_indices = @transform_15, window_bounds = array<i64: 1, 1, 10>}]} {
    %c0 = arith.constant 0 : index
    %c0_0 = arith.constant 0 : index
    %c0_1 = arith.constant 0 : index
    %c0_2 = arith.constant 0 : index
    %0 = vector.load %arg1[%c0, %c0_0, %c0_1, %c0_2] : memref<1x1x28x28xf32, #tpu.memory_space<vmem>>, vector<1x1x28x28xf32>
    %1 = vector.shape_cast %0 : vector<1x1x28x28xf32> to vector<28x28xf32>
    %2 = vector.extract_strided_slice %1 {offsets = [0, 0], sizes = [24, 28], strides = [1, 1]} : vector<28x28xf32> to vector<24x28xf32>
    %c0_3 = arith.constant 0 : index
    %c0_4 = arith.constant 0 : index
    %c0_5 = arith.constant 0 : index
    %3 = vector.load %arg2[%c0_3, %c0_4, %c0_5] : memref<5x28x144xf32, #tpu.memory_space<vmem>>, vector<1x28x144xf32>
    %4 = vector.shape_cast %3 : vector<1x28x144xf32> to vector<28x144xf32>
    %cst = arith.constant dense<0.000000e+00> : vector<24x144xf32>
    %5 = tpu.matmul %2, %4, %cst {dimension_numbers = #tpu.dot_dimension_numbers<[1], [0], [0], [1], [0, 0, 1, 1], [], []>} : vector<24x28xf32>, vector<28x144xf32>, vector<24x144xf32> -> vector<24x144xf32>
    %6 = vector.extract_strided_slice %1 {offsets = [1, 0], sizes = [24, 28], strides = [1, 1]} : vector<28x28xf32> to vector<24x28xf32>
    %c1 = arith.constant 1 : index
    %c0_6 = arith.constant 0 : index
    %c0_7 = arith.constant 0 : index
    %7 = vector.load %arg2[%c1, %c0_6, %c0_7] : memref<5x28x144xf32, #tpu.memory_space<vmem>>, vector<1x28x144xf32>
    %8 = vector.shape_cast %7 : vector<1x28x144xf32> to vector<28x144xf32>
    %cst_8 = arith.constant dense<0.000000e+00> : vector<24x144xf32>
    %9 = tpu.matmul %6, %8, %cst_8 {dimension_numbers = #tpu.dot_dimension_numbers<[1], [0], [0], [1], [0, 0, 1, 1], [], []>} : vector<24x28xf32>, vector<28x144xf32>, vector<24x144xf32> -> vector<24x144xf32>
    %10 = arith.addf %5, %9 : vector<24x144xf32>
    %11 = vector.extract_strided_slice %1 {offsets = [2, 0], sizes = [24, 28], strides = [1, 1]} : vector<28x28xf32> to vector<24x28xf32>
    %c2 = arith.constant 2 : index
    %c0_9 = arith.constant 0 : index
    %c0_10 = arith.constant 0 : index
    %12 = vector.load %arg2[%c2, %c0_9, %c0_10] : memref<5x28x144xf32, #tpu.memory_space<vmem>>, vector<1x28x144xf32>
    %13 = vector.shape_cast %12 : vector<1x28x144xf32> to vector<28x144xf32>
    %cst_11 = arith.constant dense<0.000000e+00> : vector<24x144xf32>
    %14 = tpu.matmul %11, %13, %cst_11 {dimension_numbers = #tpu.dot_dimension_numbers<[1], [0], [0], [1], [0, 0, 1, 1], [], []>} : vector<24x28xf32>, vector<28x144xf32>, vector<24x144xf32> -> vector<24x144xf32>
    %15 = arith.addf %10, %14 : vector<24x144xf32>
    %16 = vector.extract_strided_slice %1 {offsets = [3, 0], sizes = [24, 28], strides = [1, 1]} : vector<28x28xf32> to vector<24x28xf32>
    %c3 = arith.constant 3 : index
    %c0_12 = arith.constant 0 : index
    %c0_13 = arith.constant 0 : index
    %17 = vector.load %arg2[%c3, %c0_12, %c0_13] : memref<5x28x144xf32, #tpu.memory_space<vmem>>, vector<1x28x144xf32>
    %18 = vector.shape_cast %17 : vector<1x28x144xf32> to vector<28x144xf32>
    %cst_14 = arith.constant dense<0.000000e+00> : vector<24x144xf32>
    %19 = tpu.matmul %16, %18, %cst_14 {dimension_numbers = #tpu.dot_dimension_numbers<[1], [0], [0], [1], [0, 0, 1, 1], [], []>} : vector<24x28xf32>, vector<28x144xf32>, vector<24x144xf32> -> vector<24x144xf32>
    %20 = arith.addf %15, %19 : vector<24x144xf32>
    %21 = vector.extract_strided_slice %1 {offsets = [4, 0], sizes = [24, 28], strides = [1, 1]} : vector<28x28xf32> to vector<24x28xf32>
    %c4 = arith.constant 4 : index
    %c0_15 = arith.constant 0 : index
    %c0_16 = arith.constant 0 : index
    %22 = vector.load %arg2[%c4, %c0_15, %c0_16] : memref<5x28x144xf32, #tpu.memory_space<vmem>>, vector<1x28x144xf32>
    %23 = vector.shape_cast %22 : vector<1x28x144xf32> to vector<28x144xf32>
    %cst_17 = arith.constant dense<0.000000e+00> : vector<24x144xf32>
    %24 = tpu.matmul %21, %23, %cst_17 {dimension_numbers = #tpu.dot_dimension_numbers<[1], [0], [0], [1], [0, 0, 1, 1], [], []>} : vector<24x28xf32>, vector<28x144xf32>, vector<24x144xf32> -> vector<24x144xf32>
    %25 = arith.addf %20, %24 : vector<24x144xf32>
    %c0_18 = arith.constant 0 : index
    %c0_19 = arith.constant 0 : index
    %26 = vector.load %arg3[%c0_18, %c0_19] : memref<1x144xf32, #tpu.memory_space<vmem>>, vector<1x144xf32>
    %27 = vector.broadcast %26 : vector<1x144xf32> to vector<24x144xf32>
    %28 = arith.addf %25, %27 : vector<24x144xf32>
    %cst_20 = arith.constant 0.000000e+00 : f32
    %29 = vector.broadcast %cst_20 : f32 to vector<24x144xf32>
    %30 = arith.maximumf %28, %29 : vector<24x144xf32>
    %c0_21 = arith.constant 0 : index
    %c0_22 = arith.constant 0 : index
    %c0_23 = arith.constant 0 : index
    %31 = vector.load %arg4[%c0_21, %c0_22, %c0_23] : memref<2x144x72xf32, #tpu.memory_space<vmem>>, vector<1x144x72xf32>
    %32 = vector.shape_cast %31 : vector<1x144x72xf32> to vector<144x72xf32>
    %cst_24 = arith.constant dense<0.000000e+00> : vector<24x72xf32>
    %33 = tpu.matmul %30, %32, %cst_24 {dimension_numbers = #tpu.dot_dimension_numbers<[1], [0], [0], [1], [0, 0, 1, 1], [], []>} : vector<24x144xf32>, vector<144x72xf32>, vector<24x72xf32> -> vector<24x72xf32>
    %c1_25 = arith.constant 1 : index
    %c0_26 = arith.constant 0 : index
    %c0_27 = arith.constant 0 : index
    %34 = vector.load %arg4[%c1_25, %c0_26, %c0_27] : memref<2x144x72xf32, #tpu.memory_space<vmem>>, vector<1x144x72xf32>
    %35 = vector.shape_cast %34 : vector<1x144x72xf32> to vector<144x72xf32>
    %cst_28 = arith.constant dense<0.000000e+00> : vector<24x72xf32>
    %36 = tpu.matmul %30, %35, %cst_28 {dimension_numbers = #tpu.dot_dimension_numbers<[1], [0], [0], [1], [0, 0, 1, 1], [], []>} : vector<24x144xf32>, vector<144x72xf32>, vector<24x72xf32> -> vector<24x72xf32>
    %37 = arith.maximumf %33, %36 : vector<24x72xf32>
    %c0_29 = arith.constant 0 : index
    %c0_30 = arith.constant 0 : index
    %c0_31 = arith.constant 0 : index
    %38 = vector.load %arg5[%c0_29, %c0_30, %c0_31] : memref<2x12x24xf32, #tpu.memory_space<vmem>>, vector<1x12x24xf32>
    %39 = vector.shape_cast %38 : vector<1x12x24xf32> to vector<12x24xf32>
    %cst_32 = arith.constant dense<0.000000e+00> : vector<12x72xf32>
    %40 = tpu.matmul %39, %37, %cst_32 {dimension_numbers = #tpu.dot_dimension_numbers<[1], [0], [0], [1], [0, 0, 1, 1], [], []>} : vector<12x24xf32>, vector<24x72xf32>, vector<12x72xf32> -> vector<12x72xf32>
    %c1_33 = arith.constant 1 : index
    %c0_34 = arith.constant 0 : index
    %c0_35 = arith.constant 0 : index
    %41 = vector.load %arg5[%c1_33, %c0_34, %c0_35] : memref<2x12x24xf32, #tpu.memory_space<vmem>>, vector<1x12x24xf32>
    %42 = vector.shape_cast %41 : vector<1x12x24xf32> to vector<12x24xf32>
    %cst_36 = arith.constant dense<0.000000e+00> : vector<12x72xf32>
    %43 = tpu.matmul %42, %37, %cst_36 {dimension_numbers = #tpu.dot_dimension_numbers<[1], [0], [0], [1], [0, 0, 1, 1], [], []>} : vector<12x24xf32>, vector<24x72xf32>, vector<12x72xf32> -> vector<12x72xf32>
    %44 = arith.maximumf %40, %43 : vector<12x72xf32>
    %45 = vector.extract_strided_slice %44 {offsets = [0, 0], sizes = [8, 72], strides = [1, 1]} : vector<12x72xf32> to vector<8x72xf32>
    %c0_37 = arith.constant 0 : index
    %c0_38 = arith.constant 0 : index
    %c0_39 = arith.constant 0 : index
    %46 = vector.load %arg6[%c0_37, %c0_38, %c0_39] : memref<5x72x128xf32, #tpu.memory_space<vmem>>, vector<1x72x128xf32>
    %47 = vector.shape_cast %46 : vector<1x72x128xf32> to vector<72x128xf32>
    %cst_40 = arith.constant dense<0.000000e+00> : vector<8x128xf32>
    %48 = tpu.matmul %45, %47, %cst_40 {dimension_numbers = #tpu.dot_dimension_numbers<[1], [0], [0], [1], [0, 0, 1, 1], [], []>} : vector<8x72xf32>, vector<72x128xf32>, vector<8x128xf32> -> vector<8x128xf32>
    %49 = vector.extract_strided_slice %44 {offsets = [1, 0], sizes = [8, 72], strides = [1, 1]} : vector<12x72xf32> to vector<8x72xf32>
    %c1_41 = arith.constant 1 : index
    %c0_42 = arith.constant 0 : index
    %c0_43 = arith.constant 0 : index
    %50 = vector.load %arg6[%c1_41, %c0_42, %c0_43] : memref<5x72x128xf32, #tpu.memory_space<vmem>>, vector<1x72x128xf32>
    %51 = vector.shape_cast %50 : vector<1x72x128xf32> to vector<72x128xf32>
    %cst_44 = arith.constant dense<0.000000e+00> : vector<8x128xf32>
    %52 = tpu.matmul %49, %51, %cst_44 {dimension_numbers = #tpu.dot_dimension_numbers<[1], [0], [0], [1], [0, 0, 1, 1], [], []>} : vector<8x72xf32>, vector<72x128xf32>, vector<8x128xf32> -> vector<8x128xf32>
    %53 = arith.addf %48, %52 : vector<8x128xf32>
    %54 = vector.extract_strided_slice %44 {offsets = [2, 0], sizes = [8, 72], strides = [1, 1]} : vector<12x72xf32> to vector<8x72xf32>
    %c2_45 = arith.constant 2 : index
    %c0_46 = arith.constant 0 : index
    %c0_47 = arith.constant 0 : index
    %55 = vector.load %arg6[%c2_45, %c0_46, %c0_47] : memref<5x72x128xf32, #tpu.memory_space<vmem>>, vector<1x72x128xf32>
    %56 = vector.shape_cast %55 : vector<1x72x128xf32> to vector<72x128xf32>
    %cst_48 = arith.constant dense<0.000000e+00> : vector<8x128xf32>
    %57 = tpu.matmul %54, %56, %cst_48 {dimension_numbers = #tpu.dot_dimension_numbers<[1], [0], [0], [1], [0, 0, 1, 1], [], []>} : vector<8x72xf32>, vector<72x128xf32>, vector<8x128xf32> -> vector<8x128xf32>
    %58 = arith.addf %53, %57 : vector<8x128xf32>
    %59 = vector.extract_strided_slice %44 {offsets = [3, 0], sizes = [8, 72], strides = [1, 1]} : vector<12x72xf32> to vector<8x72xf32>
    %c3_49 = arith.constant 3 : index
    %c0_50 = arith.constant 0 : index
    %c0_51 = arith.constant 0 : index
    %60 = vector.load %arg6[%c3_49, %c0_50, %c0_51] : memref<5x72x128xf32, #tpu.memory_space<vmem>>, vector<1x72x128xf32>
    %61 = vector.shape_cast %60 : vector<1x72x128xf32> to vector<72x128xf32>
    %cst_52 = arith.constant dense<0.000000e+00> : vector<8x128xf32>
    %62 = tpu.matmul %59, %61, %cst_52 {dimension_numbers = #tpu.dot_dimension_numbers<[1], [0], [0], [1], [0, 0, 1, 1], [], []>} : vector<8x72xf32>, vector<72x128xf32>, vector<8x128xf32> -> vector<8x128xf32>
    %63 = arith.addf %58, %62 : vector<8x128xf32>
    %64 = vector.extract_strided_slice %44 {offsets = [4, 0], sizes = [8, 72], strides = [1, 1]} : vector<12x72xf32> to vector<8x72xf32>
    %c4_53 = arith.constant 4 : index
    %c0_54 = arith.constant 0 : index
    %c0_55 = arith.constant 0 : index
    %65 = vector.load %arg6[%c4_53, %c0_54, %c0_55] : memref<5x72x128xf32, #tpu.memory_space<vmem>>, vector<1x72x128xf32>
    %66 = vector.shape_cast %65 : vector<1x72x128xf32> to vector<72x128xf32>
    %cst_56 = arith.constant dense<0.000000e+00> : vector<8x128xf32>
    %67 = tpu.matmul %64, %66, %cst_56 {dimension_numbers = #tpu.dot_dimension_numbers<[1], [0], [0], [1], [0, 0, 1, 1], [], []>} : vector<8x72xf32>, vector<72x128xf32>, vector<8x128xf32> -> vector<8x128xf32>
    %68 = arith.addf %63, %67 : vector<8x128xf32>
    %c0_57 = arith.constant 0 : index
    %c0_58 = arith.constant 0 : index
    %69 = vector.load %arg7[%c0_57, %c0_58] : memref<1x128xf32, #tpu.memory_space<vmem>>, vector<1x128xf32>
    %70 = vector.broadcast %69 : vector<1x128xf32> to vector<8x128xf32>
    %71 = arith.addf %68, %70 : vector<8x128xf32>
    %cst_59 = arith.constant 0.000000e+00 : f32
    %72 = vector.broadcast %cst_59 : f32 to vector<8x128xf32>
    %73 = arith.maximumf %71, %72 : vector<8x128xf32>
    %c0_60 = arith.constant 0 : index
    %c0_61 = arith.constant 0 : index
    %c0_62 = arith.constant 0 : index
    %74 = vector.load %arg8[%c0_60, %c0_61, %c0_62] : memref<2x128x64xf32, #tpu.memory_space<vmem>>, vector<1x128x64xf32>
    %75 = vector.shape_cast %74 : vector<1x128x64xf32> to vector<128x64xf32>
    %cst_63 = arith.constant dense<0.000000e+00> : vector<8x64xf32>
    %76 = tpu.matmul %73, %75, %cst_63 {dimension_numbers = #tpu.dot_dimension_numbers<[1], [0], [0], [1], [0, 0, 1, 1], [], []>} : vector<8x128xf32>, vector<128x64xf32>, vector<8x64xf32> -> vector<8x64xf32>
    %c1_64 = arith.constant 1 : index
    %c0_65 = arith.constant 0 : index
    %c0_66 = arith.constant 0 : index
    %77 = vector.load %arg8[%c1_64, %c0_65, %c0_66] : memref<2x128x64xf32, #tpu.memory_space<vmem>>, vector<1x128x64xf32>
    %78 = vector.shape_cast %77 : vector<1x128x64xf32> to vector<128x64xf32>
    %cst_67 = arith.constant dense<0.000000e+00> : vector<8x64xf32>
    %79 = tpu.matmul %73, %78, %cst_67 {dimension_numbers = #tpu.dot_dimension_numbers<[1], [0], [0], [1], [0, 0, 1, 1], [], []>} : vector<8x128xf32>, vector<128x64xf32>, vector<8x64xf32> -> vector<8x64xf32>
    %80 = arith.maximumf %76, %79 : vector<8x64xf32>
    %c0_68 = arith.constant 0 : index
    %c0_69 = arith.constant 0 : index
    %c0_70 = arith.constant 0 : index
    %81 = vector.load %arg9[%c0_68, %c0_69, %c0_70] : memref<2x4x8xf32, #tpu.memory_space<vmem>>, vector<1x4x8xf32>
    %82 = vector.shape_cast %81 : vector<1x4x8xf32> to vector<4x8xf32>
    %cst_71 = arith.constant dense<0.000000e+00> : vector<4x64xf32>
    %83 = tpu.matmul %82, %80, %cst_71 {dimension_numbers = #tpu.dot_dimension_numbers<[1], [0], [0], [1], [0, 0, 1, 1], [], []>} : vector<4x8xf32>, vector<8x64xf32>, vector<4x64xf32> -> vector<4x64xf32>
    %c1_72 = arith.constant 1 : index
    %c0_73 = arith.constant 0 : index
    %c0_74 = arith.constant 0 : index
    %84 = vector.load %arg9[%c1_72, %c0_73, %c0_74] : memref<2x4x8xf32, #tpu.memory_space<vmem>>, vector<1x4x8xf32>
    %85 = vector.shape_cast %84 : vector<1x4x8xf32> to vector<4x8xf32>
    %cst_75 = arith.constant dense<0.000000e+00> : vector<4x64xf32>
    %86 = tpu.matmul %85, %80, %cst_75 {dimension_numbers = #tpu.dot_dimension_numbers<[1], [0], [0], [1], [0, 0, 1, 1], [], []>} : vector<4x8xf32>, vector<8x64xf32>, vector<4x64xf32> -> vector<4x64xf32>
    %87 = arith.maximumf %83, %86 : vector<4x64xf32>
    %c0_76 = arith.constant 0 : index
    %c0_77 = arith.constant 0 : index
    %88 = vector.load %arg10[%c0_76, %c0_77] : memref<256x120xf32, #tpu.memory_space<vmem>>, vector<256x120xf32>
    %c0_78 = arith.constant 0 : index
    %c0_79 = arith.constant 0 : index
    %89 = vector.load %arg11[%c0_78, %c0_79] : memref<1x120xf32, #tpu.memory_space<vmem>>, vector<1x120xf32>
    %90 = vector.extract_strided_slice %87 {offsets = [0, 0], sizes = [1, 64], strides = [1, 1]} : vector<4x64xf32> to vector<1x64xf32>
    %91 = vector.extract_strided_slice %88 {offsets = [0, 0], sizes = [64, 120], strides = [1, 1]} : vector<256x120xf32> to vector<64x120xf32>
    %cst_80 = arith.constant dense<0.000000e+00> : vector<1x120xf32>
    %92 = tpu.matmul %90, %91, %cst_80 {dimension_numbers = #tpu.dot_dimension_numbers<[1], [0], [0], [1], [0, 0, 1, 1], [], []>} : vector<1x64xf32>, vector<64x120xf32>, vector<1x120xf32> -> vector<1x120xf32>
    %93 = arith.addf %89, %92 : vector<1x120xf32>
    %94 = vector.extract_strided_slice %87 {offsets = [1, 0], sizes = [1, 64], strides = [1, 1]} : vector<4x64xf32> to vector<1x64xf32>
    %95 = vector.extract_strided_slice %88 {offsets = [64, 0], sizes = [64, 120], strides = [1, 1]} : vector<256x120xf32> to vector<64x120xf32>
    %cst_81 = arith.constant dense<0.000000e+00> : vector<1x120xf32>
    %96 = tpu.matmul %94, %95, %cst_81 {dimension_numbers = #tpu.dot_dimension_numbers<[1], [0], [0], [1], [0, 0, 1, 1], [], []>} : vector<1x64xf32>, vector<64x120xf32>, vector<1x120xf32> -> vector<1x120xf32>
    %97 = arith.addf %93, %96 : vector<1x120xf32>
    %98 = vector.extract_strided_slice %87 {offsets = [2, 0], sizes = [1, 64], strides = [1, 1]} : vector<4x64xf32> to vector<1x64xf32>
    %99 = vector.extract_strided_slice %88 {offsets = [128, 0], sizes = [64, 120], strides = [1, 1]} : vector<256x120xf32> to vector<64x120xf32>
    %cst_82 = arith.constant dense<0.000000e+00> : vector<1x120xf32>
    %100 = tpu.matmul %98, %99, %cst_82 {dimension_numbers = #tpu.dot_dimension_numbers<[1], [0], [0], [1], [0, 0, 1, 1], [], []>} : vector<1x64xf32>, vector<64x120xf32>, vector<1x120xf32> -> vector<1x120xf32>
    %101 = arith.addf %97, %100 : vector<1x120xf32>
    %102 = vector.extract_strided_slice %87 {offsets = [3, 0], sizes = [1, 64], strides = [1, 1]} : vector<4x64xf32> to vector<1x64xf32>
    %103 = vector.extract_strided_slice %88 {offsets = [192, 0], sizes = [64, 120], strides = [1, 1]} : vector<256x120xf32> to vector<64x120xf32>
    %cst_83 = arith.constant dense<0.000000e+00> : vector<1x120xf32>
    %104 = tpu.matmul %102, %103, %cst_83 {dimension_numbers = #tpu.dot_dimension_numbers<[1], [0], [0], [1], [0, 0, 1, 1], [], []>} : vector<1x64xf32>, vector<64x120xf32>, vector<1x120xf32> -> vector<1x120xf32>
    %105 = arith.addf %101, %104 : vector<1x120xf32>
    %cst_84 = arith.constant 0.000000e+00 : f32
    %106 = vector.broadcast %cst_84 : f32 to vector<1x120xf32>
    %107 = arith.maximumf %105, %106 : vector<1x120xf32>
    %c0_85 = arith.constant 0 : index
    %c0_86 = arith.constant 0 : index
    %108 = vector.load %arg12[%c0_85, %c0_86] : memref<120x84xf32, #tpu.memory_space<vmem>>, vector<120x84xf32>
    %cst_87 = arith.constant dense<0.000000e+00> : vector<1x84xf32>
    %109 = tpu.matmul %107, %108, %cst_87 {dimension_numbers = #tpu.dot_dimension_numbers<[1], [0], [0], [1], [0, 0, 1, 1], [], []>} : vector<1x120xf32>, vector<120x84xf32>, vector<1x84xf32> -> vector<1x84xf32>
    %c0_88 = arith.constant 0 : index
    %c0_89 = arith.constant 0 : index
    %110 = vector.load %arg13[%c0_88, %c0_89] : memref<1x84xf32, #tpu.memory_space<vmem>>, vector<1x84xf32>
    %111 = arith.addf %109, %110 : vector<1x84xf32>
    %cst_90 = arith.constant 0.000000e+00 : f32
    %112 = vector.broadcast %cst_90 : f32 to vector<1x84xf32>
    %113 = arith.maximumf %111, %112 : vector<1x84xf32>
    %c0_91 = arith.constant 0 : index
    %c0_92 = arith.constant 0 : index
    %114 = vector.load %arg14[%c0_91, %c0_92] : memref<84x10xf32, #tpu.memory_space<vmem>>, vector<84x10xf32>
    %cst_93 = arith.constant dense<0.000000e+00> : vector<1x10xf32>
    %115 = tpu.matmul %113, %114, %cst_93 {dimension_numbers = #tpu.dot_dimension_numbers<[1], [0], [0], [1], [0, 0, 1, 1], [], []>} : vector<1x84xf32>, vector<84x10xf32>, vector<1x10xf32> -> vector<1x10xf32>
    %c0_94 = arith.constant 0 : index
    %c0_95 = arith.constant 0 : index
    %116 = vector.load %arg15[%c0_94, %c0_95] : memref<1x10xf32, #tpu.memory_space<vmem>>, vector<1x10xf32>
    %117 = arith.addf %115, %116 : vector<1x10xf32>
    %cst_96 = arith.constant 0.000000e+00 : f32
    %118 = vector.broadcast %cst_96 : f32 to vector<1x10xf32>
    %119 = arith.maximumf %117, %118 : vector<1x10xf32>
    %c0_97 = arith.constant 0 : index
    %c0_98 = arith.constant 0 : index
    %c0_99 = arith.constant 0 : index
    %120 = vector.load %arg16[%c0_97, %c0_98, %c0_99] : memref<1x1x10xf32, #tpu.memory_space<vmem>>, vector<1x1x10xf32>
    %121 = vector.shape_cast %120 : vector<1x1x10xf32> to vector<1x10xf32>
    %122 = vector.shape_cast %119 : vector<1x10xf32> to vector<1x1x10xf32>
    tpu.vector_store %arg16[%c0_97, %c0_98, %c0_99], %122 {strides = array<i32>} : memref<1x1x10xf32, #tpu.memory_space<vmem>>, vector<1x1x10xf32>,
    return
  }
  func.func @transform_0(%arg0: i32) -> (i32, i32, i32, i32) {
    %c0_i32 = arith.constant 0 : i32
    %c0_i32_0 = arith.constant 0 : i32
    %c0_i32_1 = arith.constant 0 : i32
    %c0_i32_2 = arith.constant 0 : i32
    return %arg0, %c0_i32, %c0_i32_0, %c0_i32_1 : i32, i32, i32, i32
  }
  func.func @transform_1(%arg0: i32) -> (i32, i32, i32) {
    %c0_i32 = arith.constant 0 : i32
    %c0_i32_0 = arith.constant 0 : i32
    %c0_i32_1 = arith.constant 0 : i32
    %c0_i32_2 = arith.constant 0 : i32
    return %c0_i32, %c0_i32_0, %c0_i32_1 : i32, i32, i32
  }
  func.func @transform_2(%arg0: i32) -> (i32, i32) {
    %c0_i32 = arith.constant 0 : i32
    %c0_i32_0 = arith.constant 0 : i32
    %c0_i32_1 = arith.constant 0 : i32
    return %c0_i32, %c0_i32_0 : i32, i32
  }
  func.func @transform_3(%arg0: i32) -> (i32, i32, i32) {
    %c0_i32 = arith.constant 0 : i32
    %c0_i32_0 = arith.constant 0 : i32
    %c0_i32_1 = arith.constant 0 : i32
    %c0_i32_2 = arith.constant 0 : i32
    return %c0_i32, %c0_i32_0, %c0_i32_1 : i32, i32, i32
  }
  func.func @transform_4(%arg0: i32) -> (i32, i32, i32) {
    %c0_i32 = arith.constant 0 : i32
    %c0_i32_0 = arith.constant 0 : i32
    %c0_i32_1 = arith.constant 0 : i32
    %c0_i32_2 = arith.constant 0 : i32
    return %c0_i32, %c0_i32_0, %c0_i32_1 : i32, i32, i32
  }
  func.func @transform_5(%arg0: i32) -> (i32, i32, i32) {
    %c0_i32 = arith.constant 0 : i32
    %c0_i32_0 = arith.constant 0 : i32
    %c0_i32_1 = arith.constant 0 : i32
    %c0_i32_2 = arith.constant 0 : i32
    return %c0_i32, %c0_i32_0, %c0_i32_1 : i32, i32, i32
  }
  func.func @transform_6(%arg0: i32) -> (i32, i32) {
    %c0_i32 = arith.constant 0 : i32
    %c0_i32_0 = arith.constant 0 : i32
    %c0_i32_1 = arith.constant 0 : i32
    return %c0_i32, %c0_i32_0 : i32, i32
  }
  func.func @transform_7(%arg0: i32) -> (i32, i32, i32) {
    %c0_i32 = arith.constant 0 : i32
    %c0_i32_0 = arith.constant 0 : i32
    %c0_i32_1 = arith.constant 0 : i32
    %c0_i32_2 = arith.constant 0 : i32
    return %c0_i32, %c0_i32_0, %c0_i32_1 : i32, i32, i32
  }
  func.func @transform_8(%arg0: i32) -> (i32, i32, i32) {
    %c0_i32 = arith.constant 0 : i32
    %c0_i32_0 = arith.constant 0 : i32
    %c0_i32_1 = arith.constant 0 : i32
    %c0_i32_2 = arith.constant 0 : i32
    return %c0_i32, %c0_i32_0, %c0_i32_1 : i32, i32, i32
  }
  func.func @transform_9(%arg0: i32) -> (i32, i32) {
    %c0_i32 = arith.constant 0 : i32
    %c0_i32_0 = arith.constant 0 : i32
    %c0_i32_1 = arith.constant 0 : i32
    return %c0_i32, %c0_i32_0 : i32, i32
  }
  func.func @transform_10(%arg0: i32) -> (i32, i32) {
    %c0_i32 = arith.constant 0 : i32
    %c0_i32_0 = arith.constant 0 : i32
    %c0_i32_1 = arith.constant 0 : i32
    return %c0_i32, %c0_i32_0 : i32, i32
  }
  func.func @transform_11(%arg0: i32) -> (i32, i32) {
    %c0_i32 = arith.constant 0 : i32
    %c0_i32_0 = arith.constant 0 : i32
    %c0_i32_1 = arith.constant 0 : i32
    return %c0_i32, %c0_i32_0 : i32, i32
  }
  func.func @transform_12(%arg0: i32) -> (i32, i32) {
    %c0_i32 = arith.constant 0 : i32
    %c0_i32_0 = arith.constant 0 : i32
    %c0_i32_1 = arith.constant 0 : i32
    return %c0_i32, %c0_i32_0 : i32, i32
  }
  func.func @transform_13(%arg0: i32) -> (i32, i32) {
    %c0_i32 = arith.constant 0 : i32
    %c0_i32_0 = arith.constant 0 : i32
    %c0_i32_1 = arith.constant 0 : i32
    return %c0_i32, %c0_i32_0 : i32, i32
  }
  func.func @transform_14(%arg0: i32) -> (i32, i32) {
    %c0_i32 = arith.constant 0 : i32
    %c0_i32_0 = arith.constant 0 : i32
    %c0_i32_1 = arith.constant 0 : i32
    return %c0_i32, %c0_i32_0 : i32, i32
  }
  func.func @transform_15(%arg0: i32) -> (i32, i32, i32) {
    %c0_i32 = arith.constant 0 : i32
    %c0_i32_0 = arith.constant 0 : i32
    %c0_i32_1 = arith.constant 0 : i32
    return %arg0, %c0_i32, %c0_i32_0 : i32, i32, i32
  }
}

</mosaic_0001>

<bundles_post_ra>
// kernel: lenet_forward.1
= control target key start
LH: loop header
LB: loop body
LE: loop exit
PB: predicated region body
PF: predicated region fallthrough
CT: control target
= control target key end

     0   :  { %s5131_s0 = inlined_call_operand.vmem [shape: f32[2,1,28,28], index: 0, kind: input, shape index: {}]   ;;  %s5132_s1 = inlined_call_operand.vmem [shape: f32[5,28,144], index: 1, kind: input, shape index: {}]   ;;  %s5133_s2 = inlined_call_operand.vmem [shape: f32[1,144], index: 2, kind: input, shape index: {}]   ;;  %s5134_s3 = inlined_call_operand.vmem [shape: f32[2,144,72], index: 3, kind: input, shape index: {}]   ;;  %s5135_s4 = inlined_call_operand.vmem [shape: f32[2,12,24], index: 4, kind: input, shape index: {}]   ;;  %s5136_s5 = inlined_call_operand.vmem [shape: f32[5,72,128], index: 5, kind: input, shape index: {}]   ;;  %s5137_s6 = inlined_call_operand.vmem [shape: f32[1,128], index: 6, kind: input, shape index: {}]   ;;  %s5138_s7 = inlined_call_operand.vmem [shape: f32[2,128,64], index: 7, kind: input, shape index: {}]   ;;  %s5139_s8 = inlined_call_operand.vmem [shape: f32[2,4,8], index: 8, kind: input, shape index: {}]   ;;  %s5140_s9 = inlined_call_operand.vmem [shape: f32[256,120], index: 9, kind: input, shape index: {}]   ;;  %s5141_s10 = inlined_call_operand.vmem [shape: f32[1,120], index: 10, kind: input, shape index: {}]   ;;  %s5142_s11 = inlined_call_operand.vmem [shape: f32[120,84], index: 11, kind: input, shape index: {}]   ;;  %s5143_s12 = inlined_call_operand.vmem [shape: f32[1,84], index: 12, kind: input, shape index: {}]   ;;  %s5144_s13 = inlined_call_operand.vmem [shape: f32[84,10], index: 13, kind: input, shape index: {}]   ;;  %s5145_s14 = inlined_call_operand.hbm [shape: f32[1,10], index: 14, kind: input, shape index: {}]   ;;  %s5146_s15 = inlined_call_operand.hbm [shape: f32[2,1,10], index: 15, kind: output, shape index: {}]  }
   0x1   :  { %5155 = sst [smem:[#allocation13_spill]] %s5145_s14 }
   0x2   :  { %20 = vsyncpa [#allocation3], 0 }
   0x3   :  { %21 = vsyncpa [#allocation4], 0 }
   0x4   :  { %23 = vsyncpa [#allocation4 + $0x1], 0  ;;  %s4079_s18 = smov 0   ;;  %s4081_s19 = smov 0  }
   0x5   :  { %s4083_s20 = smov 0   ;;  %s4085_s21 = smov 0  }
   0x6 LB: > { %5156 = sst [smem:[#allocation8_spill]] %s3979_s18  ;;  %s4100_s22 = sadd.s32 4294967295, %s3991_s21   ;;  %s3991_s21 = sphi %s4085_s21, %s5175_s21   ;;  %s3987_s20 = sphi %s4083_s20, %s5177_s20   ;;  %s3983_s19 = sphi %s4081_s19, %s5179_s19   ;;  %s3979_s18 = sphi %s4079_s18, %s5178_s18  }
   0x7   : > { %5157 = sst [smem:[#allocation9_spill]] %s3987_s20  ;;  %s2842_s23 = sadd.s32 4294967294, %s3991_s21  }
   0x8   : > { %s4104_s24 = sadd.s32 1, %s3991_s21   ;;  %s356_s25 = sadd.s32 1, %s3987_s20 }
   0x9   : > { %5158 = sst [smem:[#allocation10_spill]] %s4104_s24  ;;  %s353_s26 = ssub.s32 %s3991_s21, %s4104_s24 }
   0xa   : > { %p366_p0 = scmp.ne.s32.totalorder %s3987_s20, %s3983_s19  ;;  %p354_p1 = scmp.eq.s32.totalorder %s353_s26, 0 }
   0xb   : > { %p367_p2 = scmp.eq.s32.totalorder %s4100_s22, 1  ;;  %p372_p3 = scmp.ne.s32.totalorder %s3983_s19, %s3979_s18 }
   0xc   : > { %p373_p4 = scmp.eq.s32.totalorder %s2842_s23, 1  ;;  %p2843_p7 = scmp.ge.s32.totalorder %s3991_s21, 1 }
   0xd   : > { %s4115_s27 = scalar_select %p354_p1, %s3987_s20, %s356_s25  }
   0xe   : > { %p4117_p5 = por %p367_p2, %p366_p0  ;;  %p4121_p6 = por %p373_p4, %p372_p3 }
   0xf   : > { %5159 = sst [smem:[#allocation11_spill]] %s4115_s27  ;;  %p380_p8 = scmp.lt.s32.totalorder %s3991_s21, 3 }
  0x10   : > { %s5160_s28 = scalar_select %p4117_p5, 1, 0 }
  0x11   : > { %s5161_s29 = scalar_select %p4121_p6, 1, 0 }
  0x12   : > { %p5152_p9 = scmp.eq.s32.totalorder %s4100_s22, 0  ;;  %p4128_p10 = pnand %p2843_p7, %p380_p8 }
  0x13   : > { %5162 = sst [smem:[#allocation12_spill]] %s5161_s29  ;;  %s3993_s16 = smov [#allocation2]  }
  0x14   : > { %s5163_s30 = scalar_select %p4128_p10, 1, 0 }
  0x15   : > { %s432_s17 = sshll.u32 %s3993_s16, 4  ;;  %p3849_p11 = pneg %p4128_p10  ;;  %s433_s17 = int_to_ptr.vmem [resolvable:$true] %s432_s17 }
  0x16   : > { %s5165_s14 = sld [smem:[#allocation13_spill]] }
  0x17   : > { %p4136_p12 = pnand %p5152_p9, %p3849_p11 }
  0x19   : > { %p3899_p0 = pneg %p4136_p12 }
  0x1c   : > { %s3897_s27 = scalar_lea.hbm %s5165_s14, 16 }
  0x1d   : > { %p3898_p13 = scmp.ne.s32.totalorder %s5165_s14, %s3897_s27  ;;  %p3904_p3 = scmp.lt.u32.totalorder %s3897_s27, %s5165_s14 }
  0x1f   : > { %p3900_p1 = pnand %p3899_p0, %p3898_p13 }
  0x21   : > { %p3901_p2 = pneg %p3900_p1 }
  0x23   : > { %p3906_p4 = pnand %p3904_p3, %p3901_p2 }
  0x25   : > { %3909 = shalt.err (!%p3906_p4)
}
  0x26   : > { %s3910_s18 = scalar_lea.vmem %s433_s17, 16  ;;  %s3917_s25 = scalar_lea.vmem %s433_s17, 32 }
  0x27   : > { %p3911_p7 = scmp.ne.s32.totalorder %s433_s17, %s3910_s18  ;;  %p3918_p9 = scmp.lt.s32.totalorder %s433_s17, %s433_s17 }
  0x28   : > { %p3919_p6 = scmp.lt.s32.totalorder %s3917_s25, %s3910_s18 }
  0x29   : > { %p3913_p8 = pnand %p3911_p7, %p3899_p0 }
  0x2a   : > { %p3920_p5 = por %p3919_p6, %p3918_p9 }
  0x2b   : > { %p3914_p11 = pneg %p3913_p8 }
  0x2d   : > { %p3921_p10 = pnand %p3920_p5, %p3914_p11 }
  0x2f   : > { %3924 = shalt.err (!%p3921_p10)
}
  0x30   : > { %3852 = dma.hbm_to_vmem [thread:$0]  (!%p4136_p12), %s5165_s14, 16, %s433_s17, [#allocation3]  }
  0x31   : > { %p5166_p13 = scmp.ne.s32.totalorder %s5163_s30, 0 }
  0x32   : > { %p5167_p1 = scmp.eq.s32.totalorder (!%p5166_p13), %s4100_s22, 0 }
  0x33   : > { %453 = sbr.rel (%p5166_p13) target bundleno = 2220 (0x8ac), region = 80 }
  0x3a   : > { %3970 = dma.done.wait (%p5167_p1), [#allocation3], 16   ;;  %p5168_p0 = pmov %p5167_p1 }
  0x3b   : > { %p500_p6 = scmp.lt.s32.totalorder %s4100_s22, 1  ;;  %v3994_v0 = vmov 0.0   ;;  %vm545_vm0 = vcmask 1043456   ;;  %v3995_v1 = vmov 0.0|0.0   ;;  %vm3996_vm1 = vmmov 1   ;;  %v2851_v3 = vld [vmem:[%s5132_s1 + $0x48] sm:$0xff] }
  0x3c   : > { %3972 = vsyncadd (%p5168_p0), [#allocation3], 4294967280  ;;  %616 = vmatprep.mubr.f32.mxu0 %v3994_v0  ;;  %3558 = vmatprep.subr.bf16.mxu1 %v3995_v1  ;;  %v2853_v4 = vld [vmem:[%s5132_s1 + $0x58] sm:$0xff]  ;;  %v2850_v5 = vld [vmem:[%s5132_s1 + $0x40] sm:$0xff]  ;;  %vm530_vm3 = vcmask 1046528   ;;  %vm538_vm4 = vcmask 228352  }
  0x3d   : > { %s501_s18 = scalar_select %p500_p6, %s4100_s22, 1  ;;  %vm4167_vm2 = vmpackc.low %vm545_vm0, %vm3996_vm1  ;;  %v3508_v6 = vpack.c.bf16 %v2853_v4, %v2851_v3  ;;  %v2852_v7 = vld [vmem:[%s5132_s1 + $0x50] sm:$0xff]  ;;  %v2855_v8 = vld [vmem:[%s5132_s1 + $0x68] sm:$0xff]  ;;  %vm739_vm5 = vcmask 1045504   ;;  %vm857_vm6 = vcmask 1044480   ;;  %vm1125_vm7 = vcmask 130048  }
  0x3e   : > { %v2857_v9 = vld [vmem:[%s5132_s1 + $0x78] sm:$0xf]  ;;  %v3510_v10 = vpack.c.bf16 %v2852_v7, %v2850_v5  ;;  %v2854_v12 = vld [vmem:[%s5132_s1 + $0x60] sm:$0xff]  ;;  %v2856_v13 = vld [vmem:[%s5132_s1 + $0x70] sm:$0xf]  ;;  %vm1319_vm8 = vcmask 195584  }
  0x3f   : > { %s3008_s27 = sshll.u32 %s501_s18, 5  ;;  %v3512_v11 = vpack.c.bf16 %v2857_v9, %v2855_v8  ;;  %3509 = vmatprep.subr.bf16.mxu0 %v3508_v6  ;;  %v510_v16 = vld [vmem:[%s5132_s1 + $0x8] sm:$0xff]  ;;  %v3515_v17 = vpack.c.bf16 %v2856_v13, %v2854_v12  ;;  %v512_v20 = vld [vmem:[%s5132_s1 + $0x18] sm:$0xff]  ;;  %v509_v23 = vld [vmem:[%s5132_s1] sm:$0xff]  ;;  %vm3997_vm9 = vmmov 0   ;;  %vm1511_vm10 = vcmask 588800  }
  0x40   : > { %s4174_s17 = scalar_lea.vmem %s5131_s0, %s3008_s27  ;;  %3511 = vmatpush1.bf16.msra.mxu0 %v3510_v10  ;;  %v3518_v22 = vpack.c.bf16 %v512_v20, %v510_v16  ;;  %v511_v24 = vld [vmem:[%s5132_s1 + $0x10] sm:$0xff]  ;;  %v514_v25 = vld [vmem:[%s5132_s1 + $0x28] sm:$0xff]  ;;  %v516_v26 = vld [vmem:[%s5132_s1 + $0x38] sm:$0xf]  ;;  %vm2098_vm11 = vcmask 64512   ;;  %vm2281_vm12 = vcmask 523264  }
  0x41   : > { %v4201_v14 = vld [vmem:[%s4174_s17] sm:$0xff]  ;;  %v4204_v15 = vld [vmem:[%s4174_s17 + $0x8] sm:$0xff]  ;;  %3514 = vmatprep.subr.msk.bf16.mxu0 %vm4167_vm2, %v3512_v11  ;;  %v4217_v21 = vld [vmem:[%s4174_s17 + $0x10] sm:$0xff]  ;;  %v3520_v29 = vpack.c.bf16 %v511_v24, %v509_v23  ;;  %v3522_v31 = vpack.c.bf16 %v516_v26, %v514_v25  ;;  %vm2595_vm13 = vcmask 982016   ;;  %vm2682_vm14 = vcmask 687104   ;;  %s498_s26 = sand.u32 1, %s3983_s19  }
  0x42   : > { %v531_v18 = vrot.slane %v4201_v14, 1  ;;  %v532_v19 = vrot.slane %v4204_v15, 1  ;;  %v534_v28 = vrot.slane %v4217_v21, 1  ;;  %v4236_v30 = vld [vmem:[%s4174_s17 + $0x18] sm:$0xf]  ;;  %v513_v32 = vld [vmem:[%s5132_s1 + $0x20] sm:$0xff] }
  0x43   : > { %v515_v33 = vld [vmem:[%s5132_s1 + $0x30] sm:$0xf]  ;;  %v2869_v34 = vld [vmem:[%s5132_s1 + $0x88] sm:$0xff]  ;;  %v2871_v35 = vld [vmem:[%s5132_s1 + $0x98] sm:$0xff]  ;;  %v536_v37 = vrot.slane %v4236_v30, 1  ;;  %v740_v6 = vrot.slane %v4201_v14, 2 }
  0x44   : > { %3517 = vmatpush1.bf16.msk.msra.mxu0 %vm4167_vm2, %v3515_v17  ;;  %v533_v27 = vsel %vm530_vm3, %v531_v18, %v532_v19  ;;  %v535_v36 = vsel %vm530_vm3, %v532_v19, %v534_v28  ;;  %v3525_v38 = vpack.c.bf16 %v515_v33, %v513_v32  ;;  %v3528_v39 = vpack.c.bf16 %v2871_v35, %v2869_v34  ;;  %v1107_v40 = vld [vmem:[%s5134_s3] sm:$0xff]  ;;  %v1108_v41 = vld [vmem:[%s5134_s3 + $0x8] sm:$0xff]  ;;  %v1109_v42 = vld [vmem:[%s5134_s3 + $0x10] sm:$0xff]  ;;  %s3005_s16 = sshll.u32 %s4100_s22, 4  ;;  %s499_s17 = scalar_lea.vmem [#allocation5], %s498_s26 }
  0x45   : > { %3519 = vmatprep.subr.bf16.mxu0 %v3518_v22  ;;  %v1110_v43 = vld [vmem:[%s5134_s3 + $0x18] sm:$0xff]  ;;  %v537_v44 = vsel %vm530_vm3, %v534_v28, %v536_v37  ;;  %v3559_v45 = vpack.c.bf16 %v1108_v41, %v1107_v40  ;;  %v2868_v46 = vld [vmem:[%s5132_s1 + $0x80] sm:$0xff]  ;;  %v2870_v47 = vld [vmem:[%s5132_s1 + $0x90] sm:$0xff]  ;;  %v741_v7 = vrot.slane %v4204_v15, 2  ;;  %v743_v18 = vrot.slane %v4217_v21, 2  ;;  %s2775_s25 = sshll.u32 %s499_s17, 4  ;;  %s5089_s24 = scalar_lea.hbm %s5146_s15, %s3005_s16  ;;  %s5091_s25 = int_to_ptr.vmem [resolvable:$true] %s2775_s25 }
  0x46   : > { %v2873_v48 = vld [vmem:[%s5132_s1 + $0xa8] sm:$0xff]  ;;  %v2875_v49 = vld [vmem:[%s5132_s1 + $0xb8] sm:$0xf]  ;;  %v3562_v50 = vpack.c.bf16 %v1110_v43, %v1109_v42  ;;  %v1111_v51 = vld [vmem:[%s5134_s3 + $0x20] sm:$0xff]  ;;  %v3530_v53 = vpack.c.bf16 %v2870_v47, %v2868_v46  ;;  %v861_v46 = vrot.slane %v4217_v21, 3  ;;  %v980_v2 = vrot.slane %v4236_v30, 4 }
  0x47   : > { %2860 = vmatmul.mubr.msk.f32.vlgmr.msra.gmra.mrb[0].mxu0 %vm538_vm4, %v533_v27  ;;  %3560 = vmatpush1.bf16.msra.mxu1 %v3559_v45  ;;  %v1112_v52 = vld [vmem:[%s5134_s3 + $0x28] sm:$0xff]  ;;  %v3532_v54 = vpack.c.bf16 %v2875_v49, %v2873_v48  ;;  %v2872_v55 = vld [vmem:[%s5132_s1 + $0xa0] sm:$0xff]  ;;  %v2874_v56 = vld [vmem:[%s5132_s1 + $0xb0] sm:$0xf]  ;;  %v742_v17 = vsel %vm739_vm5, %v740_v6, %v741_v7  ;;  %vm2760_vm15 = vcmask 73728   ;;  %s2763_s18 = scalar_lea.sflag [#allocation4], %s498_s26 }
  0x48   : > { %622 = vmatprep.mubr.f32.mxu0 %v3994_v0  ;;  %3521 = vmatpush1.bf16.msra.mxu0 %v3520_v29  ;;  %v2882_v57 = vld [vmem:[%s5132_s1 + $0xc8] sm:$0xff]  ;;  %v2884_v58 = vld [vmem:[%s5132_s1 + $0xd8] sm:$0xff]  ;;  %v3565_v59 = vpack.c.bf16 %v1112_v52, %v1111_v51  ;;  %v1113_v60 = vld [vmem:[%s5134_s3 + $0x30] sm:$0xff]  ;;  %v3535_v62 = vpack.c.bf16 %v2874_v56, %v2872_v55  ;;  %v744_v29 = vsel %vm739_vm5, %v741_v7, %v743_v18  ;;  %v863_v52 = vrot.slane %v4236_v30, 3  ;;  %s3925_s27 = scalar_lea.vmem %s5091_s25, 16  ;;  %p5171_p9 = scmp.ne.s32.totalorder %s5160_s28, 0 }
  0x49   : > { %3524 = vmatprep.subr.msk.bf16.mxu0 %vm4167_vm2, %v3522_v31  ;;  %3561 = vmatprep.subr.bf16.mxu1 %v3995_v1  ;;  %v1114_v61 = vld [vmem:[%s5134_s3 + $0x38] sm:$0xff]  ;;  %v3538_v63 = vpack.c.bf16 %v2884_v58, %v2882_v57  ;;  %v1115_v4 = vld [vmem:[%s5134_s3 + $0x40] sm:$0xff]  ;;  %v1116_v5 = vld [vmem:[%s5134_s3 + $0x48] sm:$0xff]  ;;  %v745_v31 = vrot.slane %v4236_v30, 2  ;;  %v975_v55 = vrot.slane %v4201_v14, 4  ;;  %v976_v56 = vrot.slane %v4204_v15, 4  ;;  %p3926_p5 = scmp.ne.s32.totalorder %s5091_s25, %s3925_s27 }
  0x4a   : > { %v3568_v3 = vpack.c.bf16 %v1114_v61, %v1113_v60  ;;  %v2881_v8 = vld [vmem:[%s5132_s1 + $0xc0] sm:$0xff]  ;;  %v2883_v9 = vld [vmem:[%s5132_s1 + $0xd0] sm:$0xff]  ;;  %v2886_v10 = vld [vmem:[%s5132_s1 + $0xe8] sm:$0xff]  ;;  %v3571_v12 = vpack.c.bf16 %v1116_v5, %v1115_v4  ;;  %v978_v58 = vrot.slane %v4217_v21, 4  ;;  %v1085_v30 = vlaneseq  ;;  %s3998_s22 = smov [#allocation5]  }
  0x4b   : > { %2861 = vmatmul.mubr.msk.f32.gmra.mrb[2].mxu0 %vm538_vm4, %v535_v36  ;;  %3563 = vmatpush1.bf16.msra.mxu1 %v3562_v50  ;;  %v2888_v11 = vld [vmem:[%s5132_s1 + $0xf8] sm:$0xf]  ;;  %v1117_v13 = vld [vmem:[%s5134_s3 + $0x50] sm:$0xff]  ;;  %v3540_v19 = vpack.c.bf16 %v2883_v9, %v2881_v8  ;;  %v2885_v22 = vld [vmem:[%s5132_s1 + $0xe0] sm:$0xff]  ;;  %v746_v37 = vsel %vm739_vm5, %v743_v18, %v745_v31  ;;  %v977_v57 = vsel %vm545_vm0, %v975_v55, %v976_v56  ;;  %p3927_p10 = pnand %p3926_p5, %p5171_p9  ;;  %s3929_s29 = sshll.u32 %s3998_s22, 4  ;;  %s3930_s29 = int_to_ptr.vmem [resolvable:$false] %s3929_s29 }
  0x4c   : > { %628 = vmatprep.mubr.f32.mxu0 %v3994_v0  ;;  %3527 = vmatpush1.bf16.msk.msra.mxu0 %vm4167_vm2, %v3525_v38  ;;  %v1118_v16 = vld [vmem:[%s5134_s3 + $0x58] sm:$0xff]  ;;  %v3542_v20 = vpack.c.bf16 %v2888_v11, %v2886_v10  ;;  %v2887_v23 = vld [vmem:[%s5132_s1 + $0xf0] sm:$0xf]  ;;  %v2895_v24 = vld [vmem:[%s5132_s1 + $0x108] sm:$0xff]  ;;  %v858_v38 = vrot.slane %v4201_v14, 3  ;;  %v1086_v61 = vshrl.u32 %v1085_v30, 7  ;;  %p3932_p2 = scmp.lt.s32.totalorder %s5091_s25, %s3930_s29 }
  0x4d   : > { %3529 = vmatprep.subr.bf16.mxu0 %v3528_v39  ;;  %3564 = vmatprep.subr.bf16.mxu1 %v3995_v1  ;;  %v2897_v25 = vld [vmem:[%s5132_s1 + $0x118] sm:$0xff]  ;;  %v3574_v26 = vpack.c.bf16 %v1118_v16, %v1117_v13  ;;  %v1119_v27 = vld [vmem:[%s5134_s3 + $0x60] sm:$0xff]  ;;  %v1120_v28 = vld [vmem:[%s5134_s3 + $0x68] sm:$0xff]  ;;  %v3545_v32 = vpack.c.bf16 %v2887_v23, %v2885_v22  ;;  %v859_v39 = vrot.slane %v4204_v15, 3  ;;  %p3928_p12 = pneg %p3927_p10  ;;  %s3931_s30 = scalar_lea.vmem %s3930_s29, 32 }
  0x4e   : > { %v3548_v33 = vpack.c.bf16 %v2897_v25, %v2895_v24  ;;  %v3577_v34 = vpack.c.bf16 %v1120_v28, %v1119_v27  ;;  %v1121_v35 = vld [vmem:[%s5134_s3 + $0x70] sm:$0xff]  ;;  %v1122_v36 = vld [vmem:[%s5134_s3 + $0x78] sm:$0xff]  ;;  %v2894_v40 = vld [vmem:[%s5132_s1 + $0x100] sm:$0xff]  ;;  %p3933_p3 = scmp.lt.s32.totalorder %s3931_s30, %s3925_s27 }
  0x4f   : > { %2862 = vmatmul.mubr.msk.f32.gmra.mrb[4].mxu0 %vm538_vm4, %v537_v44  ;;  %3566 = vmatpush1.bf16.msra.mxu1 %v3565_v59  ;;  %v2896_v41 = vld [vmem:[%s5132_s1 + $0x110] sm:$0xff]  ;;  %v2899_v42 = vld [vmem:[%s5132_s1 + $0x128] sm:$0xff]  ;;  %v2901_v43 = vld [vmem:[%s5132_s1 + $0x138] sm:$0xf]  ;;  %v3580_v44 = vpack.c.bf16 %v1122_v36, %v1121_v35  ;;  %v860_v45 = vsel %vm857_vm6, %v858_v38, %v859_v39  ;;  %v862_v51 = vsel %vm857_vm6, %v859_v39, %v861_v46 }
  0x50   : > { %711 = vmatprep.mubr.f32.mxu0 %v3994_v0  ;;  %3567 = vmatprep.subr.bf16.mxu1 %v3995_v1  ;;  %v3550_v47 = vpack.c.bf16 %v2896_v41, %v2894_v40  ;;  %v3552_v48 = vpack.c.bf16 %v2901_v43, %v2899_v42  ;;  %v2898_v49 = vld [vmem:[%s5132_s1 + $0x120] sm:$0xff]  ;;  %v2900_v50 = vld [vmem:[%s5132_s1 + $0x130] sm:$0xf]  ;;  %v979_v59 = vsel %vm545_vm0, %v976_v56, %v978_v58  ;;  %v2911_v10 = vld [vmem:[%s5134_s3 + $0x98] sm:$0xff]  ;;  %p3934_p4 = por %p3933_p3, %p3932_p2 }
  0x51   : > { %v2910_v9 = vld [vmem:[%s5134_s3 + $0x90] sm:$0xff]  ;;  %v2913_v22 = vld [vmem:[%s5134_s3 + $0xa8] sm:$0xff]  ;;  %v2919_v41 = vld [vmem:[%s5134_s3 + $0xd8] sm:$0xff] }
  0x52   : > { %v3586_v16 = vpack.c.bf16 %v2911_v10, %v2910_v9  ;;  %v2914_v31 = vld [vmem:[%s5134_s3 + $0xb0] sm:$0xff]  ;;  %v2917_v38 = vld [vmem:[%s5134_s3 + $0xc8] sm:$0xff]  ;;  %v2920_v43 = vld [vmem:[%s5134_s3 + $0xe0] sm:$0xff]  ;;  %p3935_p7 = pnand %p3934_p4, %p3928_p12 }
  0x53   : > { %2865 = vmatmul.mubr.msk.f32.vlgmr.msra.gmra.mrb[0].mxu0 %vm538_vm4, %v4201_v14  ;;  %3569 = vmatpush1.bf16.msra.mxu1 %v3568_v3  ;;  %v981_v14 = vsel %vm545_vm0, %v978_v58, %v980_v2  ;;  %v1091_v3 = vsub.s32 1, %v1086_v61  ;;  %v2918_v40 = vld [vmem:[%s5134_s3 + $0xd0] sm:$0xff]  ;;  %v1317_v55 = vld [vmem:[%s5135_s4] sm:$0xff]  ;;  %v2937_v56 = vld [vmem:[%s5136_s5 + $0x48] sm:$0xff] }
  0x54   : > { %717 = vmatprep.mubr.f32.mxu0 %v3994_v0  ;;  %3531 = vmatpush1.bf16.msra.mxu0 %v3530_v53  ;;  %v3555_v53 = vpack.c.bf16 %v2900_v50, %v2898_v49  ;;  %v3598_v42 = vpack.c.bf16 %v2919_v41, %v2918_v40  ;;  %v2924_v49 = vld [vmem:[%s5134_s3 + $0x100] sm:$0xff]  ;;  %v2925_v50 = vld [vmem:[%s5134_s3 + $0x108] sm:$0xff]  ;;  %v2958_v41 = vld [vmem:[%s5136_s5 + $0xd8] sm:$0xff] }
  0x55   : > { %3534 = vmatprep.subr.msk.bf16.mxu0 %vm4167_vm2, %v3532_v54  ;;  %3570 = vmatprep.subr.bf16.mxu1 %v3995_v1  ;;  %v864_v54 = vsel %vm857_vm6, %v861_v46, %v863_v52  ;;  %v2922_v46 = vld [vmem:[%s5134_s3 + $0xf0] sm:$0xff]  ;;  %v2940_v2 = vld [vmem:[%s5136_s5 + $0x60] sm:$0xff] }
  0x56   : > { %v2926_v52 = vld [vmem:[%s5134_s3 + $0x110] sm:$0xff] }
  0x57   : > { %2866 = vmatmul.mubr.msk.f32.gmra.mrb[2].mxu0 %vm538_vm4, %v4204_v15  ;;  %3572 = vmatpush1.bf16.msra.mxu1 %v3571_v12  ;;  %v1123_v15 = vld [vmem:[%s5134_s3 + $0x80] sm:$0xff] }
  0x58   : > { %723 = vmatprep.mubr.f32.mxu0 %v3994_v0  ;;  %3537 = vmatpush1.bf16.msk.msra.mxu0 %vm4167_vm2, %v3535_v62  ;;  %v1087_v62 = vsub.s32 0, %v1086_v61 }
  0x59   : > { %3539 = vmatprep.subr.bf16.mxu0 %v3538_v63  ;;  %3573 = vmatprep.subr.bf16.mxu1 %v3995_v1  ;;  %v1083_v63 = vld [vmem:[%s5133_s2] sm:$0x3] }
  0x5a   : > { %v1088_v4 = vrot.slane %v1083_v63, %v1087_v62  ;;  %v1092_v5 = vrot.slane %v1083_v63, %v1091_v3 }
  0x5b   : > { %2867 = vmatmul.mubr.msk.f32.gmra.mrb[4].mxu0 %vm538_vm4, %v4217_v21  ;;  %3575 = vmatpush1.bf16.msra.mxu1 %v3574_v26  ;;  %v1124_v21 = vld [vmem:[%s5134_s3 + $0x88] sm:$0xff] }
  0x5c   : > { %823 = vmatprep.mubr.f32.mxu0 %v3994_v0  ;;  %3576 = vmatprep.subr.bf16.mxu1 %v3995_v1  ;;  %v3583_v60 = vpack.c.bf16 %v1124_v21, %v1123_v15 }
  0x5f   : > { %2878 = vmatmul.mubr.msk.f32.vlgmr.msra.gmra.mrb[0].mxu0 %vm538_vm4, %v742_v17  ;;  %3578 = vmatpush1.bf16.msra.mxu1 %v3577_v34 }
  0x60   : > { %829 = vmatprep.mubr.f32.mxu0 %v3994_v0  ;;  %3541 = vmatpush1.bf16.msra.mxu0 %v3540_v19 }
  0x61   : > { %3544 = vmatprep.subr.msk.bf16.mxu0 %vm4167_vm2, %v3542_v20  ;;  %3579 = vmatprep.subr.bf16.mxu1 %v3995_v1  ;;  %v2912_v20 = vld [vmem:[%s5134_s3 + $0xa0] sm:$0xff] }
  0x62   : > { %v3589_v26 = vpack.c.bf16 %v2913_v22, %v2912_v20  ;;  %v1489_v20 = vld [vmem:[%s5136_s5 + $0x10] sm:$0xff]  ;;  %v1490_v22 = vld [vmem:[%s5136_s5 + $0x18] sm:$0xff] }
  0x63   : > { %2879 = vmatmul.mubr.msk.f32.gmra.mrb[2].mxu0 %vm538_vm4, %v744_v29  ;;  %3581 = vmatpush1.bf16.msra.mxu1 %v3580_v44  ;;  %v2921_v44 = vld [vmem:[%s5134_s3 + $0xe8] sm:$0xff] }
  0x64   : > { %835 = vmatprep.mubr.f32.mxu0 %v3994_v0  ;;  %3547 = vmatpush1.bf16.msk.msra.mxu0 %vm4167_vm2, %v3545_v32  ;;  %v2915_v32 = vld [vmem:[%s5134_s3 + $0xb8] sm:$0xff] }
  0x65   : > { %3549 = vmatprep.subr.bf16.mxu0 %v3548_v33  ;;  %3582 = vmatprep.subr.bf16.mxu1 %v3995_v1  ;;  %v3592_v35 = vpack.c.bf16 %v2915_v32, %v2914_v31  ;;  %v1493_v31 = vld [vmem:[%s5136_s5 + $0x30] sm:$0xff]  ;;  %v1494_v32 = vld [vmem:[%s5136_s5 + $0x38] sm:$0xff] }
  0x67   : > { %2880 = vmatmul.mubr.msk.f32.gmra.mrb[4].mxu0 %vm538_vm4, %v746_v37  ;;  %3584 = vmatpush1.bf16.msra.mxu1 %v3583_v60  ;;  %v2916_v37 = vld [vmem:[%s5134_s3 + $0xc0] sm:$0xff] }
  0x68   : > { %941 = vmatprep.mubr.f32.mxu0 %v3994_v0  ;;  %3585 = vmatprep.subr.bf16.mxu1 %v3995_v1  ;;  %v3595_v39 = vpack.c.bf16 %v2917_v38, %v2916_v37  ;;  %v1495_v37 = vld [vmem:[%s5136_s5 + $0x40] sm:$0xff]  ;;  %v2945_v38 = vld [vmem:[%s5136_s5 + $0x88] sm:$0xff] }
  0x6b   : > { %2891 = vmatmul.mubr.msk.f32.vlgmr.msra.gmra.mrb[0].mxu0 %vm538_vm4, %v860_v45  ;;  %v3601_v45 = vpack.c.bf16 %v2921_v44, %v2920_v43  ;;  %v2948_v43 = vld [vmem:[%s5136_s5 + $0x90] sm:$0xff]  ;;  %v2949_v44 = vld [vmem:[%s5136_s5 + $0x98] sm:$0xff] }
  0x6c   : > { %947 = vmatprep.mubr.f32.mxu0 %v3994_v0  ;;  %3551 = vmatpush1.bf16.msra.mxu0 %v3550_v47  ;;  %v2923_v47 = vld [vmem:[%s5134_s3 + $0xf8] sm:$0xff] }
  0x6d   : > { %3554 = vmatprep.subr.msk.bf16.mxu0 %vm4167_vm2, %v3552_v48  ;;  %v3604_v48 = vpack.c.bf16 %v2923_v47, %v2922_v46 }
  0x6f   : > { %2892 = vmatmul.mubr.msk.f32.gmra.mrb[2].mxu0 %vm538_vm4, %v862_v51  ;;  %v3607_v51 = vpack.c.bf16 %v2925_v50, %v2924_v49  ;;  %v3645_v50 = vpack.c.bf16 %v2949_v44, %v2948_v43  ;;  %v2982_v44 = vld [vmem:[%s5138_s7 + $0x98] sm:$0xff] }
  0x70   : > { %953 = vmatprep.mubr.f32.mxu0 %v3994_v0  ;;  %3557 = vmatpush1.bf16.msk.msra.mxu0 %vm4167_vm2, %v3555_v53  ;;  %v2927_v53 = vld [vmem:[%s5134_s3 + $0x118] sm:$0xff] }
  0x73   : > { %2893 = vmatmul.mubr.msk.f32.gmra.mrb[4].mxu0 %vm538_vm4, %v864_v54  ;;  %v3610_v54 = vpack.c.bf16 %v2927_v53, %v2926_v52  ;;  %v2961_v52 = vld [vmem:[%s5136_s5 + $0xf0] sm:$0xff] }
  0x74   : > { %1058 = vmatprep.mubr.f32.mxu0 %v3994_v0 }
  0x77   : > { %2904 = vmatmul.mubr.msk.f32.vlgmr.msra.gmra.mrb[0].mxu0 %vm538_vm4, %v977_v57  ;;  %v2938_v57 = vld [vmem:[%s5136_s5 + $0x50] sm:$0xff] }
  0x78   : > { %1064 = vmatprep.mubr.f32.mxu0 %v3994_v0  ;;  %v3621_v58 = vpack.c.bf16 %v2938_v57, %v2937_v56 }
  0x7b   : > { %2905 = vmatmul.mubr.msk.f32.gmra.mrb[2].mxu0 %vm538_vm4, %v979_v59  ;;  %v2939_v59 = vld [vmem:[%s5136_s5 + $0x58] sm:$0xff] }
  0x7c   : > { %1070 = vmatprep.mubr.f32.mxu0 %v3994_v0 }
  0x7f   : > { %2906 = vmatmul.mubr.msk.f32.gmra.mrb[4].mxu0 %vm538_vm4, %v981_v14  ;;  %v3624_v14 = vpack.c.bf16 %v2940_v2, %v2939_v59 }
  0x80   : > { %3177 = vmatprep.mubr.msk.f32.mxu0 %vm1319_vm8, %v1317_v55 }
 0x14a   : > { %v1060_v6 = vpop.f32.mrb[0].mxu0 }
 0x14b   : > { %v4454_v7 = vadd.f32 %v1088_v4, %v1060_v6  ;;  %v1062_v8 = vpop.f32.mrb[1].mxu0 }
 0x14c   : > { %v1096_v11 = vadd.f32 %v1092_v5, %v1062_v8 }
 0x14d   : > { %v1101_v17 = vmax.f32 %v4454_v7, 0.0 }
 0x14e   : > { %v1102_v12 = vmax.f32 %v1096_v11, 0.0  ;;  %v1066_v13 = vpop.f32.mrb[2].mxu0 }
 0x14f   : > { %v1097_v18 = vadd.f32 %v1088_v4, %v1066_v13  ;;  %v1068_v19 = vpop.f32.mrb[3].mxu0  ;;  %v2933_v13 = vld [vmem:[%s5135_s4 + $0x10] sm:$0xff] }
 0x150   : > { %v1098_v23 = vadd.f32 %v1092_v5, %v1068_v19  ;;  %2907 = vmatprep.mubr.msk.f32.mxu1 %vm1125_vm7, %v1102_v12 }
 0x151   : > { %1200 = vmatmul.mubr.f32.vlgmr.msra.gmra.mrb[0].mxu1 %v1101_v17  ;;  %v1103_v27 = vmax.f32 %v1097_v18, 0.0  ;;  %v2934_v18 = vld [vmem:[%s5135_s4 + $0x18] sm:$0xf] }
 0x152   : > { %v1104_v24 = vmax.f32 %v1098_v23, 0.0  ;;  %3587 = vmatpush1.bf16.msra.mxu1 %v3586_v16  ;;  %v1072_v25 = vpop.f32.mrb[4].mxu0  ;;  %v1487_v16 = vld [vmem:[%s5136_s5] sm:$0xff]  ;;  %v3636_v23 = vpack.c.bf16 %v1490_v22, %v1489_v20  ;;  %v2956_v20 = vld [vmem:[%s5136_s5 + $0xd0] sm:$0xff] }
 0x153   : > { %v1099_v28 = vadd.f32 %v1088_v4, %v1072_v25  ;;  %v1074_v29 = vpop.f32.mrb[5].mxu0  ;;  %3588 = vmatprep.subr.bf16.mxu1 %v3995_v1  ;;  %v1492_v25 = vld [vmem:[%s5136_s5 + $0x28] sm:$0xff] }
 0x154   : > { %v1100_v33 = vadd.f32 %v1092_v5, %v1074_v29  ;;  %2908 = vmatprep.mubr.msk.f32.mxu1 %vm1125_vm7, %v1104_v24 }
 0x155   : > { %1205 = vmatmul.mubr.f32.gmra.mrb[2].mxu1 %v1103_v27  ;;  %v1105_v36 = vmax.f32 %v1099_v28, 0.0  ;;  %v2942_v28 = vld [vmem:[%s5136_s5 + $0x70] sm:$0xff] }
 0x156   : > { %v1106_v34 = vmax.f32 %v1100_v33, 0.0  ;;  %3590 = vmatpush1.bf16.msra.mxu1 %v3589_v26  ;;  %v3642_v33 = vpack.c.bf16 %v1494_v32, %v1493_v31  ;;  %v2975_v31 = vld [vmem:[%s5136_s5 + $0x158] sm:$0xff] }
 0x157   : > { %3591 = vmatprep.subr.bf16.mxu1 %v3995_v1 }
 0x158   : > { %2909 = vmatprep.mubr.msk.f32.mxu1 %vm1125_vm7, %v1106_v34 }
 0x159   : > { %1210 = vmatmul.mubr.f32.gmra.mrb[4].mxu1 %v1105_v36 }
 0x15a   : > { %3593 = vmatpush1.bf16.msra.mxu1 %v3592_v35  ;;  %2928 = vmatprep.mubr.msk.f32.mxu1 %vm1125_vm7, %v1102_v12  ;;  %v1318_v12 = vld [vmem:[%s5135_s4 + $0x8] sm:$0xf]  ;;  %v2944_v35 = vld [vmem:[%s5136_s5 + $0x80] sm:$0xff] }
 0x15b   : > { %3594 = vmatprep.subr.bf16.mxu1 %v3995_v1 }
 0x15e   : > { %3596 = vmatpush1.bf16.msra.mxu1 %v3595_v39 }
 0x15f   : > { %3597 = vmatprep.subr.bf16.mxu1 %v3995_v1 }
 0x162   : > { %3599 = vmatpush1.bf16.msra.mxu1 %v3598_v42  ;;  %v2959_v42 = vld [vmem:[%s5136_s5 + $0xe0] sm:$0xff] }
 0x163   : > { %3600 = vmatprep.subr.bf16.mxu1 %v3995_v1 }
 0x166   : > { %3602 = vmatpush1.bf16.msra.mxu1 %v3601_v45 }
 0x167   : > { %3603 = vmatprep.subr.bf16.mxu1 %v3995_v1 }
 0x16a   : > { %3605 = vmatpush1.bf16.msra.mxu1 %v3604_v48  ;;  %v3657_v48 = vpack.c.bf16 %v2959_v42, %v2958_v41  ;;  %v1926_v41 = vld [vmem:[%s5138_s7 + $0x18] sm:$0xff]  ;;  %v2981_v42 = vld [vmem:[%s5138_s7 + $0x90] sm:$0xff] }
 0x16b   : > { %3606 = vmatprep.subr.bf16.mxu1 %v3995_v1 }
 0x16e   : > { %3608 = vmatpush1.bf16.msra.mxu1 %v3607_v51  ;;  %v2960_v51 = vld [vmem:[%s5136_s5 + $0xe8] sm:$0xff] }
 0x16f   : > { %3609 = vmatprep.subr.bf16.mxu1 %v3995_v1 }
 0x172   : > { %3611 = vmatpush1.bf16.msra.mxu1 %v3610_v54 }
 0x173   : > { %3620 = vmatprep.subr.bf16.mxu1 %v3995_v1 }
 0x175   : > { %1299 = vmatmul.mubr.f32.vlgmr.msra.gmra.mrb[6].mxu1 %v1101_v17  ;;  %v1488_v17 = vld [vmem:[%s5136_s5 + $0x8] sm:$0xff] }
 0x176   : > { %2929 = vmatprep.mubr.msk.f32.mxu1 %vm1125_vm7, %v1104_v24  ;;  %3622 = vmatpush3.bf16.msra.mxu1 %v3621_v58  ;;  %v3633_v19 = vpack.c.bf16 %v1488_v17, %v1487_v16  ;;  %v1491_v24 = vld [vmem:[%s5136_s5 + $0x20] sm:$0xff]  ;;  %v2966_v17 = vld [vmem:[%s5136_s5 + $0x118] sm:$0xff] }
 0x177   : > { %3623 = vmatprep.subr.bf16.mxu1 %v3995_v1  ;;  %v3639_v26 = vpack.c.bf16 %v1492_v25, %v1491_v24  ;;  %v2971_v24 = vld [vmem:[%s5136_s5 + $0x138] sm:$0xff] }
 0x179   : > { %1304 = vmatmul.mubr.f32.gmra.mrb[8].mxu1 %v1103_v27  ;;  %v2941_v27 = vld [vmem:[%s5136_s5 + $0x68] sm:$0xff] }
 0x17a   : > { %2930 = vmatprep.mubr.msk.f32.mxu1 %vm1125_vm7, %v1106_v34  ;;  %3625 = vmatpush3.bf16.msra.mxu1 %v3624_v14  ;;  %v3627_v29 = vpack.c.bf16 %v2942_v28, %v2941_v27  ;;  %v2943_v34 = vld [vmem:[%s5136_s5 + $0x78] sm:$0xff]  ;;  %v3660_v14 = vpack.c.bf16 %v2961_v52, %v2960_v51  ;;  %v2973_v27 = vld [vmem:[%s5136_s5 + $0x148] sm:$0xff]  ;;  %v1929_v52 = vld [vmem:[%s5138_s7 + $0x30] sm:$0xff] }
 0x17b   : > { %3626 = vmatprep.subr.bf16.mxu1 %v3995_v1 }
 0x17d   : > { %1309 = vmatmul.mubr.f32.gmra.mrb[10].mxu1 %v1105_v36  ;;  %v3630_v36 = vpack.c.bf16 %v2944_v35, %v2943_v34  ;;  %v1923_v34 = vld [vmem:[%s5138_s7] sm:$0xff]  ;;  %v1924_v35 = vld [vmem:[%s5138_s7 + $0x8] sm:$0xff] }
 0x17e   : > { %3628 = vmatpush3.bf16.msra.mxu1 %v3627_v29  ;;  %3207 = vmatprep.mubr.msk.f32.mxu1 %vm3997_vm9, %v3994_v0  ;;  %v2974_v29 = vld [vmem:[%s5136_s5 + $0x150] sm:$0xff] }
 0x17f   : > { %3629 = vmatprep.subr.bf16.mxu1 %v3995_v1  ;;  %v3678_v32 = vpack.c.bf16 %v2975_v31, %v2974_v29 }
 0x182   : > { %3631 = vmatpush3.bf16.msra.mxu1 %v3630_v36  ;;  %v2979_v36 = vld [vmem:[%s5138_s7 + $0x80] sm:$0xff] }
 0x183   : > { %3205 = vmatprep.subr.mxu1 %v3994_v0 }
 0x186   : > { %3206 = vmatpush3.msra.mxu1 %v2945_v38  ;;  %v2980_v38 = vld [vmem:[%s5138_s7 + $0x88] sm:$0xff] }
 0x187   : > { %3644 = vmatprep.subr.bf16.mxu1 %v3995_v1 }
 0x224   : > { %v1201_v15 = vpop.f32.mrb[0].mxu1 }
 0x225   : > { %v1203_v21 = vpop.f32.mrb[1].mxu1 }
 0x226   : > { %v2951_v21 = vld [vmem:[%s5136_s5 + $0xa8] sm:$0xff] }
 0x228   : > { %v1206_v60 = vpop.f32.mrb[2].mxu1 }
 0x229   : > { %v1208_v30 = vpop.f32.mrb[3].mxu1 }
 0x22a   : > { %v2962_v30 = vld [vmem:[%s5136_s5 + $0xf8] sm:$0xff] }
 0x22c   : > { %v1211_v61 = vpop.f32.mrb[4].mxu1 }
 0x22d   : > { %v1213_v62 = vpop.f32.mrb[5].mxu1 }
 0x248   : > { %v1300_v63 = vpop.f32.mrb[6].mxu1 }
 0x249   : > { %v1314_v3 = vmax.f32 %v1201_v15, %v1300_v63  ;;  %v1302_v4 = vpop.f32.mrb[7].mxu1  ;;  %v2950_v15 = vld [vmem:[%s5136_s5 + $0xa0] sm:$0xff] }
 0x24a   : > { %v3648_v4 = vpack.c.bf16 %v2951_v21, %v2950_v15 }
 0x24c   : > { %v1305_v5 = vpop.f32.mrb[8].mxu1 }
 0x24d   : > { %v1315_v6 = vmax.f32 %v1206_v60, %v1305_v5  ;;  %v1307_v7 = vpop.f32.mrb[9].mxu1 }
 0x24e   : > { %v2953_v7 = vld [vmem:[%s5136_s5 + $0xb8] sm:$0xff] }
 0x24f   : > { %v3612_v8 = vpack.c.bf16 %v1315_v6, %v1314_v3  ;;  %v2952_v6 = vld [vmem:[%s5136_s5 + $0xb0] sm:$0xff] }
 0x250   : > { %v1310_v9 = vpop.f32.mrb[10].mxu1 }
 0x251   : > { %v1316_v10 = vmax.f32 %v1211_v61, %v1310_v9  ;;  %v1312_v11 = vpop.f32.mrb[11].mxu1  ;;  %3613 = vmatprep.subr.bf16.mxu0 %v3612_v8  ;;  %v2963_v61 = vld [vmem:[%s5136_s5 + $0x100] sm:$0xff]  ;;  %v2965_v9 = vld [vmem:[%s5136_s5 + $0x110] sm:$0xff] }
 0x252   : > { %3615 = vmatpush3.bf16.msra.mxu0 %v3612_v8  ;;  %v3663_v5 = vpack.c.bf16 %v2963_v61, %v2962_v30  ;;  %v1934_v30 = vld [vmem:[%s5138_s7 + $0x58] sm:$0xff]  ;;  %v2989_v61 = vld [vmem:[%s5138_s7 + $0xd0] sm:$0xff] }
 0x253   : > { %3175 = vmatprep.subr.mxu0 %v1316_v10 }
 0x256   : > { %3176 = vmatpush3.msra.mxu0 %v1316_v10 }
 0x257   : > { %3617 = vmatprep.subr.bf16.mxu0 %v3612_v8  ;;  %3178 = vmatmul.mubr.msk.f32.vlgmr.msra.gmra.mrb[6].mxu0 %vm1319_vm8, %v1318_v12  ;;  %v2954_v12 = vld [vmem:[%s5136_s5 + $0xc0] sm:$0xff] }
 0x258   : > { %3619 = vmatpush3.bf16.msra.mxu0 %v3612_v8  ;;  %3186 = vmatprep.mubr.msk.f32.mxu0 %vm1319_vm8, %v2933_v13  ;;  %v2964_v8 = vld [vmem:[%s5136_s5 + $0x108] sm:$0xff] }
 0x259   : > { %3184 = vmatprep.subr.mxu0 %v1316_v10  ;;  %v3666_v11 = vpack.c.bf16 %v2965_v9, %v2964_v8  ;;  %v2955_v13 = vld [vmem:[%s5136_s5 + $0xc8] sm:$0xff] }
 0x25a   : > { %v3654_v16 = vpack.c.bf16 %v2955_v13, %v2954_v12  ;;  %v2992_v8 = vld [vmem:[%s5138_s7 + $0xe8] sm:$0xff]  ;;  %v2993_v13 = vld [vmem:[%s5138_s7 + $0xf0] sm:$0xff] }
 0x25c   : > { %3185 = vmatpush3.msra.mxu0 %v1316_v10  ;;  %v3651_v10 = vpack.c.bf16 %v2953_v7, %v2952_v6  ;;  %v2991_v6 = vld [vmem:[%s5138_s7 + $0xe0] sm:$0xff] }
 0x25d   : > { %3187 = vmatmul.mubr.msk.f32.vlgmr.msra.gmra.mrb[8].mxu0 %vm1319_vm8, %v2934_v18  ;;  %3632 = vmatprep.subr.bf16.mxu0 %v3995_v1  ;;  %v2968_v18 = vld [vmem:[%s5136_s5 + $0x120] sm:$0xff]  ;;  %v3723_v9 = vpack.c.bf16 %v2992_v8, %v2991_v6  ;;  %v2590_v6 = vld [vmem:[%s5142_s11 + $0x58] sm:$0xff] }
 0x25e   : > { %3634 = vmatpush3.bf16.msra.mxu0 %v3633_v19  ;;  %3228 = vmatprep.mubr.msk.f32.mxu0 %vm3997_vm9, %v3994_v0  ;;  %v2969_v19 = vld [vmem:[%s5136_s5 + $0x128] sm:$0xff] }
 0x25f   : > { %3635 = vmatprep.subr.bf16.mxu0 %v3995_v1  ;;  %v3669_v22 = vpack.c.bf16 %v2969_v19, %v2968_v18 }
 0x262   : > { %3637 = vmatpush3.bf16.msra.mxu0 %v3636_v23  ;;  %v2970_v23 = vld [vmem:[%s5136_s5 + $0x130] sm:$0xff] }
 0x263   : > { %3638 = vmatprep.subr.bf16.mxu0 %v3995_v1  ;;  %v3672_v25 = vpack.c.bf16 %v2971_v24, %v2970_v23 }
 0x266   : > { %3640 = vmatpush3.bf16.msra.mxu0 %v3639_v26  ;;  %v2972_v26 = vld [vmem:[%s5136_s5 + $0x140] sm:$0xff] }
 0x267   : > { %3641 = vmatprep.subr.bf16.mxu0 %v3995_v1  ;;  %v3675_v28 = vpack.c.bf16 %v2973_v27, %v2972_v26 }
 0x26a   : > { %3643 = vmatpush3.bf16.msra.mxu0 %v3642_v33  ;;  %v2976_v33 = vld [vmem:[%s5136_s5 + $0x160] sm:$0xff] }
 0x26b   : > { %3226 = vmatprep.subr.mxu0 %v3994_v0 }
 0x26e   : > { %3227 = vmatpush3.msra.mxu0 %v1495_v37  ;;  %v3681_v37 = vpack.c.bf16 %v1924_v35, %v1923_v34 }
 0x26f   : > { %3656 = vmatprep.subr.bf16.mxu0 %v3995_v1 }
 0x32a   : > { %v3179_v39 = vpop.f32.mrb[6].mxu0 }
 0x32b   : > { %v1392_v40 = vpop.f32.mrb[7].mxu0 }
 0x330   : > { %v3188_v45 = vpop.f32.mrb[8].mxu0 }
 0x331   : > { %v1486_v46 = vmax.f32 %v3179_v39, %v3188_v45  ;;  %v1476_v47 = vpop.f32.mrb[9].mxu0  ;;  %v3705_v39 = vpack.c.bf16 %v2980_v38, %v2979_v36  ;;  %v3708_v45 = vpack.c.bf16 %v2982_v44, %v2981_v42  ;;  %v2097_v42 = vld [vmem:[%s5139_s8] sm:$0xf]  ;;  %v2249_v44 = vld [vmem:[%s5140_s9 + $0x8] sm:$0xff] }
 0x332   : > { %v1485_v49 = vmax.f32 %v1392_v40, %v1476_v47  ;;  %v1925_v40 = vld [vmem:[%s5138_s7 + $0x10] sm:$0xff]  ;;  %v1928_v47 = vld [vmem:[%s5138_s7 + $0x28] sm:$0xff] }
 0x333   : > { %v1509_v53 = vrot.slane %v1486_v46, 1  ;;  %v1667_v54 = vrot.slane %v1486_v46, 2  ;;  %v1753_v55 = vrot.slane %v1486_v46, 3  ;;  %v1839_v56 = vrot.slane %v1486_v46, 4  ;;  %v1927_v46 = vld [vmem:[%s5138_s7 + $0x20] sm:$0xff] }
 0x334   : > { %3229 = vmatmul.mubr.msk.f32.vlgmr.msra.gmra.mrb[10].mxu0 %vm1511_vm10, %v1485_v49  ;;  %v1508_v57 = vrot.slane %v1485_v49, 1  ;;  %v1752_v58 = vrot.slane %v1485_v49, 3  ;;  %v1666_v59 = vrot.slane %v1485_v49, 2  ;;  %v1838_v2 = vrot.slane %v1485_v49, 4 }
 0x335   : > { %3658 = vmatpush3.bf16.msra.mxu0 %v3657_v48  ;;  %3270 = vmatprep.mubr.msk.f32.mxu0 %vm3997_vm9, %v3994_v0  ;;  %v3684_v43 = vpack.c.bf16 %v1926_v41, %v1925_v40  ;;  %v2983_v48 = vld [vmem:[%s5138_s7 + $0xa0] sm:$0xff]  ;;  %v3687_v49 = vpack.c.bf16 %v1928_v47, %v1927_v46  ;;  %v2250_v47 = vld [vmem:[%s5140_s9 + $0x10] sm:$0xff] }
 0x336   : > { %v1510_v60 = vsel %vm530_vm3, %v1508_v57, %v1509_v53  ;;  %3659 = vmatprep.subr.bf16.mxu0 %v3995_v1  ;;  %v1754_v62 = vsel %vm857_vm6, %v1752_v58, %v1753_v55  ;;  %v1668_v63 = vsel %vm739_vm5, %v1666_v59, %v1667_v54  ;;  %v1840_v3 = vsel %vm545_vm0, %v1838_v2, %v1839_v56  ;;  %v1930_v53 = vld [vmem:[%s5138_s7 + $0x38] sm:$0xff]  ;;  %v2985_v54 = vld [vmem:[%s5138_s7 + $0xb0] sm:$0xff]  ;;  %v1931_v58 = vld [vmem:[%s5138_s7 + $0x40] sm:$0xff] }
 0x337   : > { %3208 = vmatmul.mubr.msk.f32.vlgmr.msra.gmra.mrb[12].mxu1 %vm1511_vm10, %v1510_v60  ;;  %v3690_v55 = vpack.c.bf16 %v1930_v53, %v1929_v52  ;;  %v2986_v56 = vld [vmem:[%s5138_s7 + $0xb8] sm:$0xff]  ;;  %v1932_v59 = vld [vmem:[%s5138_s7 + $0x48] sm:$0xff]  ;;  %v2987_v2 = vld [vmem:[%s5138_s7 + $0xc0] sm:$0xff] }
 0x338   : > { %3646 = vmatpush3.bf16.msra.mxu1 %v3645_v50  ;;  %3249 = vmatprep.mubr.msk.f32.mxu1 %vm3997_vm9, %v3994_v0  ;;  %v2984_v50 = vld [vmem:[%s5138_s7 + $0xa8] sm:$0xff]  ;;  %v3714_v57 = vpack.c.bf16 %v2986_v56, %v2985_v54  ;;  %v3693_v15 = vpack.c.bf16 %v1932_v59, %v1931_v58  ;;  %v1933_v60 = vld [vmem:[%s5138_s7 + $0x50] sm:$0xff]  ;;  %v2255_v54 = vld [vmem:[%s5140_s9 + $0x38] sm:$0xff] }
 0x339   : > { %3661 = vmatpush3.bf16.msra.mxu0 %v3660_v14  ;;  %3647 = vmatprep.subr.bf16.mxu1 %v3995_v1  ;;  %v3711_v51 = vpack.c.bf16 %v2984_v50, %v2983_v48  ;;  %v2988_v14 = vld [vmem:[%s5138_s7 + $0xc8] sm:$0xff]  ;;  %v2251_v48 = vld [vmem:[%s5140_s9 + $0x18] sm:$0xff]  ;;  %v2252_v50 = vld [vmem:[%s5140_s9 + $0x20] sm:$0xff] }
 0x33a   : > { %3662 = vmatprep.subr.bf16.mxu0 %v3995_v1  ;;  %v3717_v21 = vpack.c.bf16 %v2988_v14, %v2987_v2  ;;  %v2254_v53 = vld [vmem:[%s5140_s9 + $0x30] sm:$0xff]  ;;  %v2579_v56 = vld [vmem:[%s5142_s11] sm:$0xff]  ;;  %v2582_v2 = vld [vmem:[%s5142_s11 + $0x18] sm:$0xff] }
 0x33b   : > { %v2581_v58 = vld [vmem:[%s5142_s11 + $0x10] sm:$0xff] }
 0x33c   : > { %3649 = vmatpush3.bf16.msra.mxu1 %v3648_v4  ;;  %v1935_v4 = vld [vmem:[%s5138_s7 + $0x60] sm:$0xff]  ;;  %v3780_v14 = vpack.c.bf16 %v2582_v2, %v2581_v58 }
 0x33d   : > { %3664 = vmatpush3.bf16.msra.mxu0 %v3663_v5  ;;  %3650 = vmatprep.subr.bf16.mxu1 %v3995_v1  ;;  %v1936_v5 = vld [vmem:[%s5138_s7 + $0x68] sm:$0xff]  ;;  %v2280_v2 = vld [vmem:[%s5141_s10] sm:$0x1] }
 0x33e   : > { %3665 = vmatprep.subr.bf16.mxu0 %v3995_v1  ;;  %v3699_v7 = vpack.c.bf16 %v1936_v5, %v1935_v4  ;;  %v2589_v5 = vld [vmem:[%s5142_s11 + $0x50] sm:$0xff] }
 0x340   : > { %3652 = vmatpush3.bf16.msra.mxu1 %v3651_v10  ;;  %v1937_v10 = vld [vmem:[%s5138_s7 + $0x70] sm:$0xff] }
 0x341   : > { %3667 = vmatpush3.bf16.msra.mxu0 %v3666_v11  ;;  %3653 = vmatprep.subr.bf16.mxu1 %v3995_v1  ;;  %v1938_v11 = vld [vmem:[%s5138_s7 + $0x78] sm:$0xff] }
 0x342   : > { %3268 = vmatprep.subr.mxu0 %v3994_v0  ;;  %v3702_v12 = vpack.c.bf16 %v1938_v11, %v1937_v10  ;;  %v2256_v10 = vld [vmem:[%s5140_s9 + $0x40] sm:$0xff]  ;;  %v2257_v11 = vld [vmem:[%s5140_s9 + $0x48] sm:$0xff] }
 0x344   : > { %3655 = vmatpush3.bf16.msra.mxu1 %v3654_v16  ;;  %v2994_v16 = vld [vmem:[%s5138_s7 + $0xf8] sm:$0xff] }
 0x345   : > { %3269 = vmatpush3.msra.mxu0 %v2966_v17  ;;  %3247 = vmatprep.subr.mxu1 %v3994_v0  ;;  %v3726_v17 = vpack.c.bf16 %v2994_v16, %v2993_v13  ;;  %v3741_v13 = vpack.c.bf16 %v2257_v11, %v2256_v10  ;;  %v2678_v11 = vld [vmem:[%s5144_s13 + $0x40] sm:$0xff] }
 0x346   : > { %3271 = vmatmul.mubr.msk.f32.vlgmr.msra.gmra.mrb[12].mxu0 %vm1511_vm10, %v1754_v62  ;;  %3680 = vmatprep.subr.bf16.mxu0 %v3995_v1  ;;  %v2990_v62 = vld [vmem:[%s5138_s7 + $0xd8] sm:$0xff] }
 0x347   : > { %3326 = vmatprep.mubr.msk.f32.mxu0 %vm3997_vm9, %v3994_v0  ;;  %3682 = vmatpush3.bf16.msra.mxu0 %v3681_v37 }
 0x348   : > { %3248 = vmatpush3.msra.mxu1 %v2956_v20  ;;  %3683 = vmatprep.subr.bf16.mxu0 %v3995_v1 }
 0x349   : > { %3250 = vmatmul.mubr.msk.f32.vlgmr.msra.gmra.mrb[14].mxu1 %vm1511_vm10, %v1668_v63  ;;  %3668 = vmatprep.subr.bf16.mxu1 %v3995_v1  ;;  %v3696_v63 = vpack.c.bf16 %v1934_v30, %v1933_v60  ;;  %v2585_v30 = vld [vmem:[%s5142_s11 + $0x30] sm:$0xff] }
 0x34a   : > { %3670 = vmatpush3.bf16.msra.mxu1 %v3669_v22  ;;  %3291 = vmatprep.mubr.msk.f32.mxu1 %vm3997_vm9, %v3994_v0 }
 0x34b   : > { %3671 = vmatprep.subr.bf16.mxu1 %v3995_v1  ;;  %3685 = vmatpush3.bf16.msra.mxu0 %v3684_v43  ;;  %v2248_v43 = vld [vmem:[%s5140_s9] sm:$0xff] }
 0x34c   : > { %3686 = vmatprep.subr.bf16.mxu0 %v3995_v1  ;;  %v3729_v46 = vpack.c.bf16 %v2249_v44, %v2248_v43  ;;  %v2273_v43 = vld [vmem:[%s5140_s9 + $0xc8] sm:$0xff] }
 0x34e   : > { %3673 = vmatpush3.bf16.msra.mxu1 %v3672_v25 }
 0x34f   : > { %3674 = vmatprep.subr.bf16.mxu1 %v3995_v1  ;;  %3688 = vmatpush3.bf16.msra.mxu0 %v3687_v49  ;;  %v3732_v49 = vpack.c.bf16 %v2251_v48, %v2250_v47  ;;  %v2275_v47 = vld [vmem:[%s5140_s9 + $0xd8] sm:$0xff] }
 0x350   : > { %3689 = vmatprep.subr.bf16.mxu0 %v3995_v1 }
 0x352   : > { %3676 = vmatpush3.bf16.msra.mxu1 %v3675_v28 }
 0x353   : > { %3677 = vmatprep.subr.bf16.mxu1 %v3995_v1  ;;  %3691 = vmatpush3.bf16.msra.mxu0 %v3690_v55  ;;  %v3738_v55 = vpack.c.bf16 %v2255_v54, %v2254_v53  ;;  %v2279_v53 = vld [vmem:[%s5140_s9 + $0xf8] sm:$0xff] }
 0x354   : > { %3692 = vmatprep.subr.bf16.mxu0 %v3995_v1 }
 0x356   : > { %3679 = vmatpush3.bf16.msra.mxu1 %v3678_v32  ;;  %v2978_v32 = vld [vmem:[%s5137_s6] ss:$0 sm:$0xff] }
 0x357   : > { %3289 = vmatprep.subr.mxu1 %v3994_v0  ;;  %3694 = vmatpush3.bf16.msra.mxu0 %v3693_v15  ;;  %v2583_v15 = vld [vmem:[%s5142_s11 + $0x20] sm:$0xff] }
 0x358   : > { %3695 = vmatprep.subr.bf16.mxu0 %v3995_v1 }
 0x35a   : > { %3290 = vmatpush3.msra.mxu1 %v2976_v33 }
 0x35b   : > { %3292 = vmatmul.mubr.msk.f32.vlgmr.msra.gmra.mrb[16].mxu1 %vm1511_vm10, %v1840_v3  ;;  %3704 = vmatprep.subr.bf16.mxu1 %v3995_v1  ;;  %v3720_v3 = vpack.c.bf16 %v2990_v62, %v2989_v61  ;;  %v2586_v61 = vld [vmem:[%s5142_s11 + $0x38] sm:$0xff] }
 0x35c   : > { %3361 = vmatprep.mubr.msk.f32.mxu1 %vm3997_vm9, %v3994_v0  ;;  %3706 = vmatpush3.bf16.msra.mxu1 %v3705_v39  ;;  %v3786_v62 = vpack.c.bf16 %v2586_v61, %v2585_v30 }
 0x35d   : > { %3707 = vmatprep.subr.bf16.mxu1 %v3995_v1  ;;  %3697 = vmatpush3.bf16.msra.mxu0 %v3696_v63  ;;  %v2587_v63 = vld [vmem:[%s5142_s11 + $0x40] sm:$0xff] }
 0x35e   : > { %3698 = vmatprep.subr.bf16.mxu0 %v3995_v1 }
 0x360   : > { %3709 = vmatpush3.bf16.msra.mxu1 %v3708_v45  ;;  %v2996_v45 = vld [vmem:[%s5139_s8 + $0x4] sm:$0xf] }
 0x361   : > { %3710 = vmatprep.subr.bf16.mxu1 %v3995_v1  ;;  %3700 = vmatpush3.bf16.msra.mxu0 %v3699_v7  ;;  %v3792_v7 = vpack.c.bf16 %v2590_v6, %v2589_v5  ;;  %v2674_v5 = vld [vmem:[%s5144_s13 + $0x20] sm:$0xff]  ;;  %v2675_v6 = vld [vmem:[%s5144_s13 + $0x28] sm:$0xff] }
 0x362   : > { %3701 = vmatprep.subr.bf16.mxu0 %v3995_v1 }
 0x364   : > { %3712 = vmatpush3.bf16.msra.mxu1 %v3711_v51  ;;  %v2253_v51 = vld [vmem:[%s5140_s9 + $0x28] sm:$0xff] }
 0x365   : > { %3713 = vmatprep.subr.bf16.mxu1 %v3995_v1  ;;  %3703 = vmatpush3.bf16.msra.mxu0 %v3702_v12  ;;  %v3735_v52 = vpack.c.bf16 %v2253_v51, %v2252_v50  ;;  %v2277_v50 = vld [vmem:[%s5140_s9 + $0xe8] sm:$0xff] }
 0x366   : > { %3364 = vmatprep.subr.mxu0 %v3994_v0 }
 0x368   : > { %3715 = vmatpush3.bf16.msra.mxu1 %v3714_v57  ;;  %v2580_v57 = vld [vmem:[%s5142_s11 + $0x8] sm:$0xff] }
 0x369   : > { %3716 = vmatprep.subr.bf16.mxu1 %v3995_v1  ;;  %v3777_v59 = vpack.c.bf16 %v2580_v57, %v2579_v56  ;;  %v2591_v56 = vld [vmem:[%s5142_s11 + $0x60] sm:$0xff]  ;;  %v2592_v57 = vld [vmem:[%s5142_s11 + $0x68] sm:$0xff] }
 0x36a   : > { %v3795_v58 = vpack.c.bf16 %v2592_v57, %v2591_v56 }
 0x36c   : > { %3718 = vmatpush3.bf16.msra.mxu1 %v3717_v21  ;;  %v2584_v21 = vld [vmem:[%s5142_s11 + $0x28] sm:$0xff] }
 0x36d   : > { %3719 = vmatprep.subr.bf16.mxu1 %v3995_v1  ;;  %v3783_v60 = vpack.c.bf16 %v2584_v21, %v2583_v15  ;;  %v2671_v15 = vld [vmem:[%s5144_s13 + $0x8] sm:$0xff] }
 0x370   : > { %3721 = vmatpush3.bf16.msra.mxu1 %v3720_v3  ;;  %v2588_v3 = vld [vmem:[%s5142_s11 + $0x48] sm:$0xff] }
 0x371   : > { %3722 = vmatprep.subr.bf16.mxu1 %v3995_v1  ;;  %v3789_v4 = vpack.c.bf16 %v2588_v3, %v2587_v63  ;;  %v2672_v63 = vld [vmem:[%s5144_s13 + $0x10] sm:$0xff]  ;;  %v2673_v3 = vld [vmem:[%s5144_s13 + $0x18] sm:$0xff] }
 0x374   : > { %3724 = vmatpush3.bf16.msra.mxu1 %v3723_v9 }
 0x375   : > { %3725 = vmatprep.subr.bf16.mxu1 %v3995_v1 }
 0x378   : > { %3727 = vmatpush3.bf16.msra.mxu1 %v3726_v17 }
 0x379   : > { %3776 = vmatprep.subr.bf16.mxu1 %v3995_v1 }
 0x407   : > { %v1652_v18 = vpop.f32.mrb[10].mxu0 }
 0x408   : > { %v3230_v19 = vpop.f32.mrb[11].mxu0 }
 0x409   : > { %v2259_v19 = vld [vmem:[%s5140_s9 + $0x58] sm:$0xff] }
 0x40a   : > { %v1580_v20 = vpop.f32.mrb[12].mxu1 }
 0x40b   : > { %v1653_v22 = vadd.f32 %v1652_v18, %v1580_v20  ;;  %v3209_v23 = vpop.f32.mrb[13].mxu1  ;;  %v2258_v18 = vld [vmem:[%s5140_s9 + $0x50] sm:$0xff] }
 0x40c   : > { %v3744_v20 = vpack.c.bf16 %v2259_v19, %v2258_v18  ;;  %v2261_v23 = vld [vmem:[%s5140_s9 + $0x68] sm:$0xff] }
 0x419   : > { %v1823_v24 = vpop.f32.mrb[12].mxu0 }
 0x41a   : > { %v3272_v25 = vpop.f32.mrb[13].mxu0 }
 0x41b   : > { %v2262_v25 = vld [vmem:[%s5140_s9 + $0x70] sm:$0xff] }
 0x41c   : > { %v1737_v26 = vpop.f32.mrb[14].mxu1 }
 0x41d   : > { %v1741_v27 = vadd.f32 %v1737_v26, %v1653_v22  ;;  %v3251_v28 = vpop.f32.mrb[15].mxu1  ;;  %v2260_v22 = vld [vmem:[%s5140_s9 + $0x60] sm:$0xff]  ;;  %v2263_v26 = vld [vmem:[%s5140_s9 + $0x78] sm:$0xff] }
 0x41e   : > { %v2264_v28 = vld [vmem:[%s5140_s9 + $0x80] sm:$0xff] }
 0x41f   : > { %v1827_v29 = vadd.f32 %v1823_v24, %v1741_v27  ;;  %v3747_v24 = vpack.c.bf16 %v2261_v23, %v2260_v22  ;;  %v3750_v27 = vpack.c.bf16 %v2263_v26, %v2262_v25  ;;  %v2681_v22 = vld [vmem:[#allocation2] sm:$0x1] }
 0x42e   : > { %v1909_v31 = vpop.f32.mrb[16].mxu1 }
 0x42f   : > { %v1913_v33 = vadd.f32 %v1909_v31, %v1827_v29  ;;  %v3293_v34 = vpop.f32.mrb[17].mxu1  ;;  %v2265_v29 = vld [vmem:[%s5140_s9 + $0x88] sm:$0xff] }
 0x430   : > { %v3753_v31 = vpack.c.bf16 %v2265_v29, %v2264_v28  ;;  %v2267_v34 = vld [vmem:[%s5140_s9 + $0x98] sm:$0xff] }
 0x431   : > { %v1921_v35 = vadd.f32 %v2978_v32, %v1913_v33  ;;  %v2266_v33 = vld [vmem:[%s5140_s9 + $0x90] sm:$0xff] }
 0x433   : > { %v1922_v36 = vmax.f32 %v1921_v35, 0.0  ;;  %v3756_v35 = vpack.c.bf16 %v2267_v34, %v2266_v33 }
 0x435   : > { %3327 = vmatmul.mubr.f32.vlgmr.msra.gmra.mrb[14].mxu0 %v1922_v36  ;;  %3362 = vmatmul.mubr.f32.vlgmr.msra.gmra.mrb[18].mxu1 %v1922_v36  ;;  %v2268_v36 = vld [vmem:[%s5140_s9 + $0xa0] sm:$0xff] }
 0x436   : > { %3366 = vmatprep.mubr.msk.f32.mxu0 %vm3997_vm9, %v3994_v0  ;;  %3480 = vmatprep.mubr.msk.f32.mxu1 %vm3997_vm9, %v3994_v0 }
 0x437   : > { %3778 = vmatpush3.bf16.msra.mxu1 %v3777_v59  ;;  %v2593_v59 = vld [vmem:[%s5142_s11 + $0x70] sm:$0xff] }
 0x438   : > { %3779 = vmatprep.subr.bf16.mxu1 %v3995_v1 }
 0x43b   : > { %3781 = vmatpush3.bf16.msra.mxu1 %v3780_v14  ;;  %v2670_v14 = vld [vmem:[%s5144_s13] sm:$0xff] }
 0x43c   : > { %3782 = vmatprep.subr.bf16.mxu1 %v3995_v1  ;;  %v3798_v61 = vpack.c.bf16 %v2671_v15, %v2670_v14 }
 0x43f   : > { %3784 = vmatpush3.bf16.msra.mxu1 %v3783_v60 }
 0x440   : > { %3785 = vmatprep.subr.bf16.mxu1 %v3995_v1 }
 0x443   : > { %3787 = vmatpush3.bf16.msra.mxu1 %v3786_v62 }
 0x444   : > { %3788 = vmatprep.subr.bf16.mxu1 %v3995_v1 }
 0x447   : > { %3790 = vmatpush3.bf16.msra.mxu1 %v3789_v4  ;;  %v3801_v4 = vpack.c.bf16 %v2673_v3, %v2672_v63 }
 0x448   : > { %3791 = vmatprep.subr.bf16.mxu1 %v3995_v1 }
 0x44b   : > { %3793 = vmatpush3.bf16.msra.mxu1 %v3792_v7  ;;  %v3804_v7 = vpack.c.bf16 %v2675_v6, %v2674_v5 }
 0x44c   : > { %3794 = vmatprep.subr.bf16.mxu1 %v3995_v1 }
 0x44f   : > { %3796 = vmatpush3.bf16.msra.mxu1 %v3795_v58 }
 0x450   : > { %3478 = vmatprep.subr.mxu1 %v3994_v0 }
 0x453   : > { %3479 = vmatpush3.msra.mxu1 %v2593_v59 }
 0x454   : > { %3797 = vmatprep.subr.bf16.mxu1 %v3995_v1 }
 0x508   : > { %v2005_v37 = vpop.f32.mrb[14].mxu0  ;;  %v2092_v38 = vpop.f32.mrb[18].mxu1 }
 0x509   : > { %v2096_v39 = vmax.f32 %v2005_v37, %v2092_v38  ;;  %v3328_v40 = vpop.f32.mrb[15].mxu0  ;;  %v3363_v41 = vpop.f32.mrb[19].mxu1  ;;  %v2269_v37 = vld [vmem:[%s5140_s9 + $0xa8] sm:$0xff] }
 0x50a   : > { %v3759_v38 = vpack.c.bf16 %v2269_v37, %v2268_v36  ;;  %v2271_v40 = vld [vmem:[%s5140_s9 + $0xb8] sm:$0xff] }
 0x50b   : > { %3365 = vmatpush3.msra.mxu0 %v2096_v39 }
 0x50c   : > { %3367 = vmatmul.mubr.msk.f32.vlgmr.msra.gmra.mrb[16].mxu0 %vm2098_vm11, %v2097_v42  ;;  %3369 = vmatprep.subr.mxu0 %v3994_v0  ;;  %v2272_v42 = vld [vmem:[%s5140_s9 + $0xc0] sm:$0xff] }
 0x50d   : > { %3370 = vmatpush3.msra.mxu0 %v2096_v39  ;;  %3371 = vmatprep.mubr.msk.f32.mxu0 %vm3997_vm9, %v3994_v0  ;;  %v2270_v39 = vld [vmem:[%s5140_s9 + $0xb0] sm:$0xff]  ;;  %v3765_v44 = vpack.c.bf16 %v2273_v43, %v2272_v42 }
 0x50e   : > { %3728 = vmatprep.subr.bf16.mxu0 %v3995_v1  ;;  %v3762_v41 = vpack.c.bf16 %v2271_v40, %v2270_v39 }
 0x510   : > { %3372 = vmatmul.mubr.msk.f32.vlgmr.msra.gmra.mrb[18].mxu0 %vm2098_vm11, %v2996_v45 }
 0x511   : > { %3730 = vmatpush3.bf16.msra.mxu0 %v3729_v46  ;;  %3390 = vmatprep.mubr.msk.f32.mxu0 %vm3997_vm9, %v3994_v0  ;;  %v2274_v46 = vld [vmem:[%s5140_s9 + $0xd0] sm:$0xff] }
 0x512   : > { %3731 = vmatprep.subr.bf16.mxu0 %v3995_v1  ;;  %v3768_v48 = vpack.c.bf16 %v2275_v47, %v2274_v46 }
 0x515   : > { %3733 = vmatpush3.bf16.msra.mxu0 %v3732_v49  ;;  %v2276_v49 = vld [vmem:[%s5140_s9 + $0xe0] sm:$0xff] }
 0x516   : > { %3734 = vmatprep.subr.bf16.mxu0 %v3995_v1  ;;  %v3771_v51 = vpack.c.bf16 %v2277_v50, %v2276_v49 }
 0x519   : > { %3736 = vmatpush3.bf16.msra.mxu0 %v3735_v52  ;;  %v2278_v52 = vld [vmem:[%s5140_s9 + $0xf0] sm:$0xff] }
 0x51a   : > { %3737 = vmatprep.subr.bf16.mxu0 %v3995_v1  ;;  %v3774_v54 = vpack.c.bf16 %v2279_v53, %v2278_v52 }
 0x51d   : > { %3739 = vmatpush3.bf16.msra.mxu0 %v3738_v55 }
 0x51e   : > { %3740 = vmatprep.subr.bf16.mxu0 %v3995_v1 }
 0x5df   : > { %v2168_v8 = vpop.f32.mrb[16].mxu0 }
 0x5e0   : > { %v3368_v9 = vpop.f32.mrb[17].mxu0 }
 0x5e1   : > { %v2677_v9 = vld [vmem:[%s5144_s13 + $0x38] sm:$0xff] }
 0x5e3   : > { %v2243_v12 = vpop.f32.mrb[18].mxu0 }
 0x5e4   : > { %v4933_v16 = vmax.f32 %v2168_v8, %v2243_v12  ;;  %v3373_v17 = vpop.f32.mrb[19].mxu0  ;;  %v2676_v8 = vld [vmem:[%s5144_s13 + $0x30] sm:$0xff]  ;;  %v2679_v12 = vld [vmem:[%s5144_s13 + $0x48] sm:$0xff] }
 0x5e5   : > { %v3807_v10 = vpack.c.bf16 %v2677_v9, %v2676_v8 }
 0x5e6   : > { %3391 = vmatmul.mubr.msk.f32.vlgmr.msra.gmra.mrb[20].mxu0 %vm2281_vm12, %v4933_v16  ;;  %v2356_v32 = vrot.slane %v4933_v16, 1  ;;  %v2430_v45 = vrot.slane %v4933_v16, 2  ;;  %v2504_v55 = vrot.slane %v4933_v16, 3  ;;  %v2680_v16 = vld [vmem:[%s5144_s13 + $0x50] sm:$0xf] }
 0x5e7   : > { %3742 = vmatpush3.bf16.msra.mxu0 %v3741_v13  ;;  %3409 = vmatprep.mubr.msk.f32.mxu0 %vm3997_vm9, %v3994_v0  ;;  %v3810_v13 = vpack.c.bf16 %v2679_v12, %v2678_v11 }
 0x5e8   : > { %3743 = vmatprep.subr.bf16.mxu0 %v3995_v1 }
 0x5eb   : > { %3745 = vmatpush3.bf16.msra.mxu0 %v3744_v20 }
 0x5ec   : > { %3746 = vmatprep.subr.bf16.mxu0 %v3995_v1 }
 0x5ef   : > { %3748 = vmatpush3.bf16.msra.mxu0 %v3747_v24 }
 0x5f0   : > { %3749 = vmatprep.subr.bf16.mxu0 %v3995_v1 }
 0x5f3   : > { %3751 = vmatpush3.bf16.msra.mxu0 %v3750_v27 }
 0x5f4   : > { %3752 = vmatprep.subr.bf16.mxu0 %v3995_v1 }
 0x5f6   : > { %3410 = vmatmul.mubr.msk.f32.vlgmr.msra.gmra.mrb[20].mxu0 %vm2281_vm12, %v2356_v32 }
 0x5f7   : > { %3754 = vmatpush3.bf16.msra.mxu0 %v3753_v31  ;;  %3428 = vmatprep.mubr.msk.f32.mxu0 %vm3997_vm9, %v3994_v0 }
 0x5f8   : > { %3755 = vmatprep.subr.bf16.mxu0 %v3995_v1 }
 0x5fb   : > { %3757 = vmatpush3.bf16.msra.mxu0 %v3756_v35 }
 0x5fc   : > { %3758 = vmatprep.subr.bf16.mxu0 %v3995_v1 }
 0x5ff   : > { %3760 = vmatpush3.bf16.msra.mxu0 %v3759_v38 }
 0x600   : > { %3761 = vmatprep.subr.bf16.mxu0 %v3995_v1 }
 0x603   : > { %3763 = vmatpush3.bf16.msra.mxu0 %v3762_v41 }
 0x604   : > { %3764 = vmatprep.subr.bf16.mxu0 %v3995_v1 }
 0x606   : > { %3429 = vmatmul.mubr.msk.f32.vlgmr.msra.gmra.mrb[20].mxu0 %vm2281_vm12, %v2430_v45 }
 0x607   : > { %3766 = vmatpush3.bf16.msra.mxu0 %v3765_v44  ;;  %3447 = vmatprep.mubr.msk.f32.mxu0 %vm3997_vm9, %v3994_v0 }
 0x608   : > { %3767 = vmatprep.subr.bf16.mxu0 %v3995_v1 }
 0x60b   : > { %3769 = vmatpush3.bf16.msra.mxu0 %v3768_v48 }
 0x60c   : > { %3770 = vmatprep.subr.bf16.mxu0 %v3995_v1 }
 0x60f   : > { %3772 = vmatpush3.bf16.msra.mxu0 %v3771_v51 }
 0x610   : > { %3773 = vmatprep.subr.bf16.mxu0 %v3995_v1 }
 0x613   : > { %3775 = vmatpush3.bf16.msra.mxu0 %v3774_v54 }
 0x616   : > { %3448 = vmatmul.mubr.msk.f32.vlgmr.msra.gmra.mrb[20].mxu0 %vm2281_vm12, %v2504_v55 }
 0x6e9   : > { %v2573_v21 = vpop.f32.mrb[20].mxu0 }
 0x6ea   : > { %v3812_v60 = vadd.f32 %v2573_v21, %v2280_v2  ;;  %v3449_v30 = vpop.f32.mrb[21].mxu0 }
 0x6ec   : > { %v2578_v62 = vmax.f32 %v3812_v60, 0.0 }
 0x6ee   : > { %3481 = vmatmul.mubr.msk.f32.vlgmr.msra.gmra.mrb[20].mxu1 %vm2595_vm13, %v2578_v62 }
 0x6ef   : > { %3799 = vmatpush3.bf16.msra.mxu1 %v3798_v61  ;;  %3505 = vmatprep.mubr.msk.f32.mxu1 %vm3997_vm9, %v3994_v0 }
 0x6f0   : > { %3800 = vmatprep.subr.bf16.mxu1 %v3995_v1 }
 0x6f3   : > { %3802 = vmatpush3.bf16.msra.mxu1 %v3801_v4 }
 0x6f4   : > { %3803 = vmatprep.subr.bf16.mxu1 %v3995_v1 }
 0x6f7   : > { %3805 = vmatpush3.bf16.msra.mxu1 %v3804_v7 }
 0x6f8   : > { %3806 = vmatprep.subr.bf16.mxu1 %v3995_v1 }
 0x6fb   : > { %3808 = vmatpush3.bf16.msra.mxu1 %v3807_v10 }
 0x6fc   : > { %3809 = vmatprep.subr.bf16.mxu1 %v3995_v1  ;;  %v2594_v1 = vld [vmem:[%s5143_s12] sm:$0x1] }
 0x6ff   : > { %3811 = vmatpush3.bf16.msra.mxu1 %v3810_v13 }
 0x700   : > { %3503 = vmatprep.subr.mxu1 %v3994_v0 }
 0x703   : > { %3504 = vmatpush3.msk.msra.mxu1 %vm545_vm0, %v2680_v16 }
 0x7c1   : > { %v2665_v17 = vpop.f32.mrb[20].mxu1 }
 0x7c2   : > { %v2666_v18 = vadd.f32 %v2665_v17, %v2594_v1  ;;  %v3482_v19 = vpop.f32.mrb[21].mxu1 }
 0x7c4   : > { %v2669_v20 = vmax.f32 %v2666_v18, 0.0 }
 0x7c6   : > { %3506 = vmatmul.mubr.msk.f32.vlgmr.msra.gmra.mrb[22].mxu1 %vm2682_vm14, %v2669_v20 }
 0x899   : > { %v2755_v0 = vpop.f32.mrb[22].mxu1 }
 0x89a   : > { %v2756_v23 = vadd.f32 %v2755_v0, %v2681_v22  ;;  %v3507_v24 = vpop.f32.mrb[23].mxu1 }
 0x89c   : > { %v2759_v25 = vmax.f32 %v2756_v23, 0.0 }
 0x89e   : > { %2761 = vst.msk [vmem:[%s499_s17] sm:$0x1] %vm2760_vm15, %v2759_v25 }
 0x89f   : > { %3938 = shalt.err (!%p3935_p7)
}
 0x8a0   : > { %s3939_s23 = scalar_lea.hbm %s5089_s24, 16  ;;  %s3943_s17 = scalar_lea.hbm %s5146_s15, 32 }
 0x8a1   : > { %p3940_p8 = scmp.ne.s32.totalorder %s5089_s24, %s3939_s23  ;;  %p3944_p1 = scmp.lt.u32.totalorder %s5089_s24, %s5146_s15 }
 0x8a2   : > { %p3945_p0 = scmp.lt.u32.totalorder %s3943_s17, %s3939_s23  ;;  %p3947_p5 = scmp.lt.u32.totalorder %s3939_s23, %s5089_s24 }
 0x8a3   : > { %p3941_p11 = pnand %p3940_p8, %p5171_p9 }
 0x8a4   : > { %p3946_p6 = por %p3945_p0, %p3944_p1 }
 0x8a5   : > { %p3942_p13 = pneg %p3941_p11 }
 0x8a6   : > { %p3948_p10 = por %p3947_p5, %p3946_p6 }
 0x8a8   : > { %p3949_p12 = pnand %p3948_p10, %p3942_p13 }
 0x8aa   : > { %3952 = shalt.err (!%p3949_p12)
}
 0x8ab   : > { %3847 = dma.vmem_to_hbm [thread:$0]  (%p5171_p9), %s5091_s25, 16, %s5089_s24, %s2763_s18  }
 0x8ac PF: > { %s5172_s27 = sld [smem:[#allocation8_spill]]  ;;  %s5173_s22 = sld [smem:[#allocation12_spill]] }
 0x8ad   : > { %p3859_p2 = scmp.ge.s32.totalorder %s3991_s21, 2 }
 0x8b2   : > { %s2787_s29 = sand.u32 1, %s5172_s27   ;;  %p5174_p3 = scmp.ne.s32.totalorder %s5173_s22, 0 }
 0x8b3   : > { %s2788_s30 = scalar_lea.sflag [#allocation4], %s2787_s29 }
 0x8b4   : > { %p3854_p4 = pnand %p3859_p2, %p5174_p3 }
 0x8b6   : > { %3974 = dma.done.wait (!%p3854_p4), %s2788_s30, 16  }
 0x8b7   : > { %3976 = vsyncadd (!%p3854_p4), %s2788_s30, 4294967280  ;;  %s5175_s21 = sld [smem:[#allocation10_spill]]  ;;  %s5176_s23 = sld [smem:[#allocation9_spill]] }
 0x8b8   : > { %s5177_s20 = sld [smem:[#allocation11_spill]]  ;;  %s5178_s18 = smov %s3983_s19 }
 0x8bd   : > { %p26_p7 = scmp.ge.s32.totalorder %s5175_s21, 4   ;;  %s5179_s19 = smov %s5176_s23 }
 0x8bf   :  { %28 = sbr.rel (!%p26_p7) target bundleno = 6 (0x6), region = 132 }
 0x8c6   :  { %2792 = vsyncpa [#allocation3], 1 }
 0x8c7   :  { %2794 = vsyncpa [#allocation3 + $0x1], 1 }
 0x8c8   :  { %2795 = vsyncpa [#allocation4], 1 }
 0x8c9   :  { %2797 = vsyncpa [#allocation4 + $0x1], 1 }

</bundles_post_ra>
